<compile_context>
chip_gen: v7x
topology: tpu7x:2x2x1
jax: 0.10.0
libtpu: 0.0.40
codegen_flags: <defaults>
</compile_context>

<pallas_src>
import jax
import jax.numpy as jnp
from jax.experimental import pallas as pl
from jax.experimental.pallas import tpu as pltpu

# ----------------------------- config (synthetic) -----------------------------
IMG_DIM = 2048                 # config.img_dim (ResNet-101 pooled feature dim)
CLASSIFIER_HIDDEN_DIM = 512    # config.classifier_hidden_dim
NUM_CLASSES = 4                # config.num_classes
F_DROPOUT = 0.1                # config.f_dropout (inference mode -> identity)
LEAKY_SLOPE = 0.01             # nn.LeakyReLU default negative_slope


# ------------------------------- Pallas kernel --------------------------------
def _im_classifier_kernel(x_ref, w1_ref, b1_ref, w2_ref, b2_ref, out_ref):
    # x_ref: (TB, D) bf16 image features (dense, contiguous block).
    x = x_ref[...]

    # Linear(img_dim -> classifier_hidden_dim); bf16 MXU, f32 accumulation.
    h = jnp.dot(x, w1_ref[...], preferred_element_type=jnp.float32)
    h = h + b1_ref[...]                                   # f32 bias bcast from (1, H)

    # LeakyReLU (negative_slope = 0.01): max form = one fewer VALU op than select.
    h = jnp.maximum(h, LEAKY_SLOPE * h)

    # Dropout(f_dropout): identity in eval/inference mode.
    # TODO(synk): training-mode dropout would need pltpu.prng_seed/prng_random_bits.

    # Linear(classifier_hidden_dim -> num_classes_padded); bf16 MXU, f32 accum.
    logits = jnp.dot(h.astype(jnp.bfloat16), w2_ref[...],
                     preferred_element_type=jnp.float32)
    logits = logits + b2_ref[...]                         # f32 bias bcast from (1, C_pad)

    out_ref[...] = logits.astype(out_ref.dtype)


# ------------------------- one-time parameter preparation ---------------------
def prepare_im_params(w1, b1, w2, b2):
    """Cast weights to bf16 and lane-pad classifier columns to a multiple of 128.

    Call ONCE at model-setup time (not per forward) so XLA does not re-materialize
    padded/cast copies in HBM on every call.
    """
    C = w2.shape[1]
    C_pad = ((C + 127) // 128) * 128
    return dict(
        w1=w1.astype(jnp.bfloat16),
        b1=b1.reshape(1, -1).astype(jnp.float32),
        w2=jnp.pad(w2, ((0, 0), (0, C_pad - C))).astype(jnp.bfloat16),
        b2=jnp.pad(b2.reshape(1, -1), ((0, 0), (0, C_pad - C))).astype(jnp.float32),
        num_classes=C,
    )


# --------------------------------- wrapper ------------------------------------
def im_classifier_forward(feat, params, *, batch_tile=256):
    """Pallas implementation of IM.forward's classifier head.

    feat:   (B, img_dim) ResNet pooled feature (any float dtype; cast to bf16)
    params: output of prepare_im_params()
    returns logits: (B, num_classes) float32
    """
    B, D = feat.shape
    w1, b1, w2, b2 = params["w1"], params["b1"], params["w2"], params["b2"]
    C = params["num_classes"]
    H = w1.shape[1]
    C_pad = w2.shape[1]

    x = feat.astype(jnp.bfloat16)

    if B <= batch_tile:
        # Small batch: single invocation, no grid machinery, whole arrays in VMEM.
        # TODO(synk): in a serving loop the per-call W1 stream dominates here; a
        # cross-pallas_call persistent weight buffer (prefetch future) would remove
        # it, but is not implemented in this self-contained script.
        out = pl.pallas_call(
            _im_classifier_kernel,
            out_shape=jax.ShapeDtypeStruct((B, C_pad), jnp.float32),
        )(x, w1, b1, w2, b2)
    else:
        # Large batch: tile the batch; weights stay VMEM-resident across steps.
        TB = batch_tile
        n_tiles = pl.cdiv(B, TB)
        B_pad = n_tiles * TB
        # Prefer a TB that divides B (and yields an even n_tiles for v7x's two TCs)
        # so this pad is a no-op.
        x_p = jnp.pad(x, ((0, B_pad - B), (0, 0))) if B_pad != B else x

        # VMEM budget (bf16 act/weights, f32 out): double-buffered streaming tiles
        # + resident weights, plus headroom. Keeps v7x (64 MiB physical) happy.
        vmem_bytes = (2 * TB * D * 2          # activation tile, double buffered
                      + 2 * D * H * 2         # W1
                      + 2 * H * C_pad * 2     # W2
                      + 2 * TB * C_pad * 4    # output tile, double buffered
                      + 4 * (H + C_pad) * 4)  # biases
        vmem_limit = min(int(vmem_bytes * 1.5) + (4 << 20), 64 << 20)

        out = pl.pallas_call(
            _im_classifier_kernel,
            out_shape=jax.ShapeDtypeStruct((B_pad, C_pad), jnp.float32),
            grid_spec=pltpu.PrefetchScalarGridSpec(
                num_scalar_prefetch=0,
                grid=(n_tiles,),
                in_specs=[
                    pl.BlockSpec((TB, D), lambda i: (i, 0)),       # activations stream
                    pl.BlockSpec((D, H), lambda i: (0, 0)),        # weights resident
                    pl.BlockSpec((1, H), lambda i: (0, 0)),
                    pl.BlockSpec((H, C_pad), lambda i: (0, 0)),
                    pl.BlockSpec((1, C_pad), lambda i: (0, 0)),
                ],
                out_specs=pl.BlockSpec((TB, C_pad), lambda i: (i, 0)),
            ),
            compiler_params=pltpu.CompilerParams(
                dimension_semantics=("parallel",),   # shards across TCs on v7x
                vmem_limit_bytes=vmem_limit),
        )(x_p, w1, b1, w2, b2)
        out = out[:B]

    return out[:, :C]


# ------------------------------ reference (JAX) --------------------------------
def im_classifier_ref(feat, w1, b1, w2, b2):
    h = feat @ w1 + b1[0]
    h = jnp.where(h > 0, h, LEAKY_SLOPE * h)
    return h @ w2 + b2[0]


# ----------------------------------- main --------------------------------------
if __name__ == "__main__":
    key = jax.random.PRNGKey(0)
    k_x, k_w1, k_b1, k_w2, k_b2, k_x2 = jax.random.split(key, 6)

    B = 8
    D, H, C = IMG_DIM, CLASSIFIER_HIDDEN_DIM, NUM_CLASSES

    # Synthetic ResNet-101 pooled image features.
    feat = jax.random.normal(k_x, (B, D), dtype=jnp.float32)

    # Deterministic classifier parameters (stored as (in, out); JAX convention).
    w1 = jax.random.normal(k_w1, (D, H), dtype=jnp.float32) * 0.02
    b1 = jax.random.normal(k_b1, (1, H), dtype=jnp.float32) * 0.02
    w2 = jax.random.normal(k_w2, (H, C), dtype=jnp.float32) * 0.02
    b2 = jax.random.normal(k_b2, (1, C), dtype=jnp.float32) * 0.02

    # One-time parameter prep (bf16 cast + lane padding), outside the forward path.
    params = prepare_im_params(w1, b1, w2, b2)

    # ---- small-batch path (no grid) ----
    logits = im_classifier_forward(feat, params)
    logits = jax.block_until_ready(logits)
    ref = im_classifier_ref(feat, w1, b1, w2, b2)
    assert logits.shape == (B, C)
    assert jnp.allclose(logits, ref, atol=2e-2, rtol=2e-2), \
        "mismatch vs reference (small batch)"

    # ---- large-batch path (batch tiled, weights resident, even tile count) ----
    B2 = 512
    feat2 = jax.random.normal(k_x2, (B2, D), dtype=jnp.float32)
    logits2 = im_classifier_forward(feat2, params, batch_tile=256)
    logits2 = jax.block_until_ready(logits2)
    ref2 = im_classifier_ref(feat2, w1, b1, w2, b2)
    assert logits2.shape == (B2, C)
    assert jnp.allclose(logits2, ref2, atol=2e-2, rtol=2e-2), \
        "mismatch vs reference (tiled batch)"

    print("KERNEL_OK")
</pallas_src>

<mosaic_0001>
module attributes {stable_mosaic.version = 11 : i64} {
  func.func @_im_classifier_kernel(%arg0: memref<8x2048xbf16, #tpu.memory_space<vmem>>, %arg1: memref<2048x512xbf16, #tpu.memory_space<vmem>>, %arg2: memref<1x512xf32, #tpu.memory_space<vmem>>, %arg3: memref<512x128xbf16, #tpu.memory_space<vmem>>, %arg4: memref<1x128xf32, #tpu.memory_space<vmem>>, %arg5: memref<8x128xf32, #tpu.memory_space<vmem>>) attributes {dimension_semantics = [], scalar_prefetch = 0 : i64, scratch_operands = 0 : i64, tpu.core_type = #tpu.core_type<tc>} {
    %c0 = arith.constant 0 : index
    %c0_0 = arith.constant 0 : index
    %0 = vector.load %arg0[%c0, %c0_0] : memref<8x2048xbf16, #tpu.memory_space<vmem>>, vector<8x2048xbf16>
    %c0_1 = arith.constant 0 : index
    %c0_2 = arith.constant 0 : index
    %1 = vector.load %arg1[%c0_1, %c0_2] : memref<2048x512xbf16, #tpu.memory_space<vmem>>, vector<2048x512xbf16>
    %cst = arith.constant dense<0.000000e+00> : vector<8x512xf32>
    %2 = tpu.matmul %0, %1, %cst {dimension_numbers = #tpu.dot_dimension_numbers<[1], [0], [0], [1], [0, 0, 1, 1], [], []>} : vector<8x2048xbf16>, vector<2048x512xbf16>, vector<8x512xf32> -> vector<8x512xf32>
    %c0_3 = arith.constant 0 : index
    %c0_4 = arith.constant 0 : index
    %3 = vector.load %arg2[%c0_3, %c0_4] : memref<1x512xf32, #tpu.memory_space<vmem>>, vector<1x512xf32>
    %4 = vector.broadcast %3 : vector<1x512xf32> to vector<8x512xf32>
    %5 = arith.addf %2, %4 : vector<8x512xf32>
    %cst_5 = arith.constant 0.00999999977 : f32
    %6 = vector.broadcast %cst_5 : f32 to vector<8x512xf32>
    %7 = arith.mulf %6, %5 : vector<8x512xf32>
    %8 = arith.maximumf %5, %7 : vector<8x512xf32>
    %9 = arith.truncf %8 : vector<8x512xf32> to vector<8x512xbf16>
    %c0_6 = arith.constant 0 : index
    %c0_7 = arith.constant 0 : index
    %10 = vector.load %arg3[%c0_6, %c0_7] : memref<512x128xbf16, #tpu.memory_space<vmem>>, vector<512x128xbf16>
    %cst_8 = arith.constant dense<0.000000e+00> : vector<8x128xf32>
    %11 = tpu.matmul %9, %10, %cst_8 {dimension_numbers = #tpu.dot_dimension_numbers<[1], [0], [0], [1], [0, 0, 1, 1], [], []>} : vector<8x512xbf16>, vector<512x128xbf16>, vector<8x128xf32> -> vector<8x128xf32>
    %c0_9 = arith.constant 0 : index
    %c0_10 = arith.constant 0 : index
    %12 = vector.load %arg4[%c0_9, %c0_10] : memref<1x128xf32, #tpu.memory_space<vmem>>, vector<1x128xf32>
    %13 = vector.broadcast %12 : vector<1x128xf32> to vector<8x128xf32>
    %14 = arith.addf %11, %13 : vector<8x128xf32>
    %c0_11 = arith.constant 0 : index
    %c0_12 = arith.constant 0 : index
    %15 = vector.load %arg5[%c0_11, %c0_12] : memref<8x128xf32, #tpu.memory_space<vmem>>, vector<8x128xf32>
    tpu.vector_store %arg5[%c0_11, %c0_12], %14 {strides = array<i32>} : memref<8x128xf32, #tpu.memory_space<vmem>>, vector<8x128xf32>,
    return
  }
}

</mosaic_0001>

<bundles_post_ra>
// kernel: tpu_custom_call.1
= control target key start
LH: loop header
LB: loop body
LE: loop exit
PB: predicated region body
PF: predicated region fallthrough
CT: control target
= control target key end

     0   :  { %10 = vsyncpa [#allocation3], 0  ;;  %s6056_s0 = inlined_call_operand.hbm [shape: bf16[8,2048], index: 0, kind: input, shape index: {}]   ;;  %s6057_s1 = inlined_call_operand.hbm [shape: bf16[2048,512], index: 1, kind: input, shape index: {}]   ;;  %s6058_s2 = inlined_call_operand.hbm [shape: f32[1,512], index: 2, kind: input, shape index: {}]   ;;  %s6059_s3 = inlined_call_operand.hbm [shape: bf16[512,128], index: 3, kind: input, shape index: {}]   ;;  %s6060_s4 = inlined_call_operand.hbm [shape: f32[1,128], index: 4, kind: input, shape index: {}]   ;;  %s6061_s5 = inlined_call_operand.hbm [shape: f32[8,128], index: 5, kind: output, shape index: {}]  }
   0x1   :  { %11 = vsyncpa [#allocation6], 0 }
   0x2   :  { %12 = vsyncpa [#allocation9], 0 }
   0x3   :  { %13 = vsyncpa [#allocation4], 0  ;;  %s5902_s18 = smov [#allocation5]   ;;  %s5762_s22 = scalar_lea.hbm %s6057_s1, 65536 }
   0x4   :  { %s29_s19 = sshll.u32 %s5902_s18, 4  ;;  %p5763_p0 = scmp.ne.s32.totalorder %s6057_s1, %s5762_s22  ;;  %s30_s19 = int_to_ptr.vmem [resolvable:$true] %s29_s19 }
   0x5   :  { %p5766_p1 = scmp.lt.u32.totalorder %s5762_s22, %s6057_s1 }
   0x7   :  { %p5768_p2 = pnand %p5766_p1, %p5763_p0 }
   0x9   :  { %5771 = shalt.err (!%p5768_p2)
}
   0xa   :  { %s5772_s27 = scalar_lea.vmem %s30_s19, 65536  ;;  %p5777_p4 = scmp.lt.s32.totalorder %s30_s19, %s30_s19 }
   0xb   :  { %p5773_p3 = scmp.ne.s32.totalorder %s30_s19, %s5772_s27  ;;  %p5778_p5 = scmp.lt.s32.totalorder %s5772_s27, %s5772_s27 }
   0xd   :  { %p5779_p6 = por %p5778_p5, %p5777_p4 }
   0xf   :  { %p5780_p7 = pnand %p5779_p6, %p5773_p3 }
  0x11   :  { %5783 = shalt.err (!%p5780_p7)
}
  0x12   :  { %s5903_s28 = smov 256   ;;  %s5904_s29 = smov 16  }
  0x13   :  { %35 = dma.hbm_to_vmem [thread:$0]  %s6057_s1, 65536, %s30_s19, [#allocation6], %s5903_s28, %s5903_s28, %s5904_s29  }
  0x14   :  { %s5905_s7 = smov [#allocation8]   ;;  %s5784_s11 = scalar_lea.hbm %s6059_s3, 4096 }
  0x15   :  { %s51_s8 = sshll.u32 %s5905_s7, 4  ;;  %p5785_p8 = scmp.ne.s32.totalorder %s6059_s3, %s5784_s11  ;;  %s52_s8 = int_to_ptr.vmem [resolvable:$true] %s51_s8 }
  0x16   :  { %p5788_p9 = scmp.lt.u32.totalorder %s5784_s11, %s6059_s3 }
  0x18   :  { %p5790_p10 = pnand %p5788_p9, %p5785_p8 }
  0x1a   :  { %5793 = shalt.err (!%p5790_p10)
}
  0x1b   :  { %s5794_s16 = scalar_lea.vmem %s52_s8, 4096  ;;  %p5799_p12 = scmp.lt.s32.totalorder %s52_s8, %s52_s8 }
  0x1c   :  { %p5795_p11 = scmp.ne.s32.totalorder %s52_s8, %s5794_s16  ;;  %p5800_p13 = scmp.lt.s32.totalorder %s5794_s16, %s5794_s16 }
  0x1e   :  { %p5801_p0 = por %p5800_p13, %p5799_p12 }
  0x20   :  { %p5802_p1 = pnand %p5801_p0, %p5795_p11 }
  0x22   :  { %5805 = shalt.err (!%p5802_p1)
}
  0x23   :  { %s5906_s1 = smov 64   ;;  %s5907_s17 = smov 4  }
  0x24   :  { %57 = dma.hbm_to_vmem [thread:$0]  %s6059_s3, 4096, %s52_s8, [#allocation9], %s5906_s1, %s5906_s1, %s5907_s17  }
  0x25   :  { %s5908_s20 = smov [#allocation2]   ;;  %s5909_s22 = smov [#allocation7]  }
  0x26   :  { %s20_s21 = sshll.u32 %s5908_s20, 4  ;;  %s42_s23 = sshll.u32 %s5909_s22, 4  ;;  %s21_s21 = int_to_ptr.vmem [resolvable:$true] %s20_s21  ;;  %s43_s23 = int_to_ptr.vmem [resolvable:$true] %s42_s23 }
  0x27   :  { %s5806_s26 = scalar_lea.hbm %s6056_s0, 1024 }
  0x28   :  { %p5807_p2 = scmp.ne.s32.totalorder %s6056_s0, %s5806_s26  ;;  %p5810_p3 = scmp.lt.u32.totalorder %s5806_s26, %s6056_s0 }
  0x2a   :  { %p5812_p4 = pnand %p5810_p3, %p5807_p2 }
  0x2c   :  { %5815 = shalt.err (!%p5812_p4)
}
  0x2d   :  { %s5816_s3 = scalar_lea.vmem %s21_s21, 1024  ;;  %p5821_p6 = scmp.lt.s32.totalorder %s21_s21, %s21_s21 }
  0x2e   :  { %p5817_p5 = scmp.ne.s32.totalorder %s21_s21, %s5816_s3  ;;  %p5822_p7 = scmp.lt.s32.totalorder %s5816_s3, %s5816_s3 }
  0x30   :  { %p5823_p8 = por %p5822_p7, %p5821_p6 }
  0x32   :  { %p5824_p9 = pnand %p5823_p8, %p5817_p5 }
  0x34   :  { %5827 = shalt.err (!%p5824_p9)
}
  0x35   :  { %23 = dma.hbm_to_vmem [thread:$0]  %s6056_s0, 1024, %s21_s21, [#allocation3]  }
  0x36   :  { %s5828_s10 = scalar_lea.hbm %s6058_s2, 64 }
  0x37   :  { %p5829_p10 = scmp.ne.s32.totalorder %s6058_s2, %s5828_s10  ;;  %p5832_p11 = scmp.lt.u32.totalorder %s5828_s10, %s6058_s2 }
  0x39   :  { %p5834_p12 = pnand %p5832_p11, %p5829_p10 }
  0x3b   :  { %5837 = shalt.err (!%p5834_p12)
}
  0x3c   :  { %s5838_s15 = scalar_lea.vmem %s43_s23, 64  ;;  %p5843_p0 = scmp.lt.s32.totalorder %s43_s23, %s43_s23 }
  0x3d   :  { %p5839_p13 = scmp.ne.s32.totalorder %s43_s23, %s5838_s15  ;;  %p5844_p1 = scmp.lt.s32.totalorder %s5838_s15, %s5838_s15 }
  0x3f   :  { %p5845_p2 = por %p5844_p1, %p5843_p0 }
  0x41   :  { %p5846_p3 = pnand %p5845_p2, %p5839_p13 }
  0x43   :  { %5849 = shalt.err (!%p5846_p3)
}
  0x44   :  { %45 = dma.hbm_to_vmem [thread:$0]  %s6058_s2, 64, %s43_s23, [#allocation6]  }
  0x45   :  { %s5910_s1 = smov [#allocation10]   ;;  %s5850_s20 = scalar_lea.hbm %s6060_s4, 16 }
  0x46   :  { %s64_s17 = sshll.u32 %s5910_s1, 4  ;;  %p5851_p4 = scmp.ne.s32.totalorder %s6060_s4, %s5850_s20  ;;  %s65_s17 = int_to_ptr.vmem [resolvable:$true] %s64_s17 }
  0x47   :  { %p5854_p5 = scmp.lt.u32.totalorder %s5850_s20, %s6060_s4 }
  0x49   :  { %p5856_p6 = pnand %p5854_p5, %p5851_p4 }
  0x4b   :  { %5859 = shalt.err (!%p5856_p6)
}
  0x4c   :  { %s5860_s26 = scalar_lea.vmem %s65_s17, 16  ;;  %s5864_s2 = scalar_lea.vmem %s65_s17, 32 }
  0x4d   :  { %p5861_p7 = scmp.ne.s32.totalorder %s65_s17, %s5860_s26  ;;  %p5865_p8 = scmp.lt.s32.totalorder %s65_s17, %s65_s17 }
  0x4e   :  { %p5866_p9 = scmp.lt.s32.totalorder %s5864_s2, %s5860_s26 }
  0x50   :  { %p5867_p10 = por %p5866_p9, %p5865_p8 }
  0x52   :  { %p5868_p11 = pnand %p5867_p10, %p5861_p7 }
  0x54   :  { %5871 = shalt.err (!%p5868_p11)
}
  0x55   :  { %67 = dma.hbm_to_vmem [thread:$0]  %s6060_s4, 16, %s65_s17, [#allocation9]  }
  0x56   :  { %5894 = dma.done.wait [#allocation3], 1024  }
  0x57   :  { %5895 = vsyncadd [#allocation3], 4294966272 }
  0x58   :  { %5896 = dma.done.wait [#allocation6], 65600  }
  0x59   :  { %5897 = vsyncadd [#allocation6], 4294901696 }
  0x5a   :  { %5898 = dma.done.wait [#allocation9], 4112  }
  0x5b   :  { %5899 = vsyncadd [#allocation9], 4294963184  ;;  %v4946_v0 = vld [vmem:[#allocation5 + $0x4] ss:$16 sps:$4 sm:$0xff]   ;;  %v4948_v1 = vld [vmem:[#allocation5 + $0xc] ss:$16 sps:$4 sm:$0xff]  }
  0x5c   :  { %3242 = vmatprep.subr.bf16.mxu0 %v4946_v0  ;;  %v4950_v2 = vld [vmem:[#allocation5] ss:$16 sps:$4 sm:$0xff]   ;;  %v4951_v3 = vld [vmem:[#allocation5 + $0x8] ss:$16 sps:$4 sm:$0xff]   ;;  %3570 = vmatprep.subr.bf16.mxu1 %v4948_v1  ;;  %v4952_v4 = vld [vmem:[#allocation5 + $0x24] ss:$16 sps:$4 sm:$0xff]  }
  0x5d   :  { %3243 = vmatpush1.bf16.msra.mxu0 %v4950_v2  ;;  %3571 = vmatpush1.bf16.msra.mxu1 %v4951_v3  ;;  %v4954_v5 = vld [vmem:[#allocation5 + $0x2c] ss:$16 sps:$4 sm:$0xff]   ;;  %v4956_v6 = vld [vmem:[#allocation5 + $0x20] ss:$16 sps:$4 sm:$0xff]   ;;  %v4957_v7 = vld [vmem:[#allocation5 + $0x28] ss:$16 sps:$4 sm:$0xff]  }
  0x5e   :  { %3244 = vmatprep.subr.bf16.mxu0 %v4952_v4  ;;  %3572 = vmatprep.subr.bf16.mxu1 %v4954_v5  ;;  %v4958_v8 = vld [vmem:[#allocation5 + $0x44] ss:$16 sps:$4 sm:$0xff]   ;;  %v4960_v9 = vld [vmem:[#allocation5 + $0x4c] ss:$16 sps:$4 sm:$0xff]   ;;  %v4962_v10 = vld [vmem:[#allocation5 + $0x40] ss:$16 sps:$4 sm:$0xff]  }
  0x5f   :  { %v4963_v11 = vld [vmem:[#allocation5 + $0x48] ss:$16 sps:$4 sm:$0xff]   ;;  %v4964_v12 = vld [vmem:[#allocation5 + $0x64] ss:$16 sps:$4 sm:$0xff]   ;;  %v4966_v13 = vld [vmem:[#allocation5 + $0x6c] ss:$16 sps:$4 sm:$0xff]  }
  0x60   :  { %v4968_v14 = vld [vmem:[#allocation5 + $0x60] ss:$16 sps:$4 sm:$0xff]   ;;  %v4969_v15 = vld [vmem:[#allocation5 + $0x68] ss:$16 sps:$4 sm:$0xff]   ;;  %v4970_v16 = vld [vmem:[#allocation5 + $0x84] ss:$16 sps:$4 sm:$0xff]  }
  0x61   :  { %3245 = vmatpush1.bf16.msra.mxu0 %v4956_v6  ;;  %3573 = vmatpush1.bf16.msra.mxu1 %v4957_v7  ;;  %v4972_v17 = vld [vmem:[#allocation5 + $0x8c] ss:$16 sps:$4 sm:$0xff]   ;;  %v4974_v18 = vld [vmem:[#allocation5 + $0x80] ss:$16 sps:$4 sm:$0xff]   ;;  %v4975_v19 = vld [vmem:[#allocation5 + $0x88] ss:$16 sps:$4 sm:$0xff]  }
  0x62   :  { %3246 = vmatprep.subr.bf16.mxu0 %v4958_v8  ;;  %3574 = vmatprep.subr.bf16.mxu1 %v4960_v9  ;;  %v4976_v20 = vld [vmem:[#allocation5 + $0xa4] ss:$16 sps:$4 sm:$0xff]   ;;  %v4978_v21 = vld [vmem:[#allocation5 + $0xac] ss:$16 sps:$4 sm:$0xff]   ;;  %v4980_v22 = vld [vmem:[#allocation5 + $0xa0] ss:$16 sps:$4 sm:$0xff]  }
  0x63   :  { %v4981_v23 = vld [vmem:[#allocation5 + $0xa8] ss:$16 sps:$4 sm:$0xff]   ;;  %v4982_v24 = vld [vmem:[#allocation5 + $0xc4] ss:$16 sps:$4 sm:$0xff]   ;;  %v4984_v25 = vld [vmem:[#allocation5 + $0xcc] ss:$16 sps:$4 sm:$0xff]  }
  0x64   :  { %v4986_v26 = vld [vmem:[#allocation5 + $0xc0] ss:$16 sps:$4 sm:$0xff]   ;;  %v4987_v27 = vld [vmem:[#allocation5 + $0xc8] ss:$16 sps:$4 sm:$0xff]   ;;  %v4988_v28 = vld [vmem:[#allocation5 + $0xe4] ss:$16 sps:$4 sm:$0xff]  }
  0x65   :  { %3247 = vmatpush1.bf16.msra.mxu0 %v4962_v10  ;;  %3575 = vmatpush1.bf16.msra.mxu1 %v4963_v11  ;;  %v4990_v29 = vld [vmem:[#allocation5 + $0xec] ss:$16 sps:$4 sm:$0xff]   ;;  %v4992_v30 = vld [vmem:[#allocation5 + $0xe0] ss:$16 sps:$4 sm:$0xff]   ;;  %v4993_v31 = vld [vmem:[#allocation5 + $0xe8] ss:$16 sps:$4 sm:$0xff]  }
  0x66   :  { %3248 = vmatprep.subr.bf16.mxu0 %v4964_v12  ;;  %3576 = vmatprep.subr.bf16.mxu1 %v4966_v13  ;;  %v4994_v32 = vld [vmem:[#allocation5 + $0x104] ss:$16 sps:$4 sm:$0xff]   ;;  %v4996_v33 = vld [vmem:[#allocation5 + $0x10c] ss:$16 sps:$4 sm:$0xff]   ;;  %v4998_v34 = vld [vmem:[#allocation5 + $0x100] ss:$16 sps:$4 sm:$0xff]  }
  0x67   :  { %v4999_v35 = vld [vmem:[#allocation5 + $0x108] ss:$16 sps:$4 sm:$0xff]   ;;  %v5000_v36 = vld [vmem:[#allocation5 + $0x124] ss:$16 sps:$4 sm:$0xff]   ;;  %v5002_v37 = vld [vmem:[#allocation5 + $0x12c] ss:$16 sps:$4 sm:$0xff]  }
  0x68   :  { %v5004_v38 = vld [vmem:[#allocation5 + $0x120] ss:$16 sps:$4 sm:$0xff]   ;;  %v5005_v39 = vld [vmem:[#allocation5 + $0x128] ss:$16 sps:$4 sm:$0xff]   ;;  %v5006_v40 = vld [vmem:[#allocation5 + $0x144] ss:$16 sps:$4 sm:$0xff]  }
  0x69   :  { %3249 = vmatpush1.bf16.msra.mxu0 %v4968_v14  ;;  %3577 = vmatpush1.bf16.msra.mxu1 %v4969_v15  ;;  %v5008_v41 = vld [vmem:[#allocation5 + $0x14c] ss:$16 sps:$4 sm:$0xff]   ;;  %v5010_v42 = vld [vmem:[#allocation5 + $0x140] ss:$16 sps:$4 sm:$0xff]   ;;  %v5011_v43 = vld [vmem:[#allocation5 + $0x148] ss:$16 sps:$4 sm:$0xff]  }
  0x6a   :  { %3250 = vmatprep.subr.bf16.mxu0 %v4970_v16  ;;  %3578 = vmatprep.subr.bf16.mxu1 %v4972_v17  ;;  %v5012_v44 = vld [vmem:[#allocation5 + $0x164] ss:$16 sps:$4 sm:$0xff]   ;;  %v5014_v45 = vld [vmem:[#allocation5 + $0x16c] ss:$16 sps:$4 sm:$0xff]   ;;  %v5016_v47 = vld [vmem:[#allocation5 + $0x160] ss:$16 sps:$4 sm:$0xff]  }
  0x6b   :  { %v84_v46 = vld [vmem:[#allocation2] sm:$0xff]  ;;  %v5017_v49 = vld [vmem:[#allocation5 + $0x168] ss:$16 sps:$4 sm:$0xff]   ;;  %v5020_v51 = vld [vmem:[#allocation5 + $0x18c] ss:$16 sps:$4 sm:$0xff]   ;;  %s5911_s4 = smov [#allocation11]  }
  0x6c   :  { %v4272_v48 = vcombine.high %v84_v46, %v84_v46  ;;  %v5018_v50 = vld [vmem:[#allocation5 + $0x184] ss:$16 sps:$4 sm:$0xff]   ;;  %v5022_v52 = vld [vmem:[#allocation5 + $0x180] ss:$16 sps:$4 sm:$0xff]   ;;  %v5023_v53 = vld [vmem:[#allocation5 + $0x188] ss:$16 sps:$4 sm:$0xff]   ;;  %v4271_v4 = vcombine.low %v84_v46, %v84_v46 }
  0x6d   :  { %3251 = vmatpush1.bf16.msra.mxu0 %v4974_v18  ;;  %3579 = vmatpush1.bf16.msra.mxu1 %v4975_v19  ;;  %v5024_v54 = vld [vmem:[#allocation5 + $0x1a4] ss:$16 sps:$4 sm:$0xff]   ;;  %v5026_v55 = vld [vmem:[#allocation5 + $0x1ac] ss:$16 sps:$4 sm:$0xff]   ;;  %v5028_v56 = vld [vmem:[#allocation5 + $0x1a0] ss:$16 sps:$4 sm:$0xff]  }
  0x6e   :  { %3252 = vmatprep.subr.bf16.mxu0 %v4976_v20  ;;  %3580 = vmatprep.subr.bf16.mxu1 %v4978_v21  ;;  %v5029_v57 = vld [vmem:[#allocation5 + $0x1a8] ss:$16 sps:$4 sm:$0xff]   ;;  %v5030_v58 = vld [vmem:[#allocation5 + $0x1c4] ss:$16 sps:$4 sm:$0xff]   ;;  %v5032_v59 = vld [vmem:[#allocation5 + $0x1cc] ss:$16 sps:$4 sm:$0xff]  }
  0x6f   :  { %3274 = vmatprep.mubr.bf16.mxu0 %v4272_v48  ;;  %3602 = vmatprep.mubr.bf16.mxu1 %v4272_v48  ;;  %v5034_v60 = vld [vmem:[#allocation5 + $0x1c0] ss:$16 sps:$4 sm:$0xff]   ;;  %v5035_v61 = vld [vmem:[#allocation5 + $0x1c8] ss:$16 sps:$4 sm:$0xff]   ;;  %v5036_v62 = vld [vmem:[#allocation5 + $0x1e4] ss:$16 sps:$4 sm:$0xff]  }
  0x70   :  { %v5038_v63 = vld [vmem:[#allocation5 + $0x1ec] ss:$16 sps:$4 sm:$0xff]   ;;  %v5040_v0 = vld [vmem:[#allocation5 + $0x1e0] ss:$16 sps:$4 sm:$0xff]   ;;  %v5041_v1 = vld [vmem:[#allocation5 + $0x1e8] ss:$16 sps:$4 sm:$0xff]  }
  0x71   :  { %3253 = vmatpush1.bf16.msra.mxu0 %v4980_v22  ;;  %3581 = vmatpush1.bf16.msra.mxu1 %v4981_v23  ;;  %v5046_v2 = vld [vmem:[#allocation5 + $0x204] ss:$16 sps:$4 sm:$0xff]   ;;  %v5049_v3 = vld [vmem:[#allocation5 + $0x20c] ss:$16 sps:$4 sm:$0xff]   ;;  %v5044_v5 = vld [vmem:[#allocation5 + $0x200] ss:$16 sps:$4 sm:$0xff]  }
  0x72   :  { %3254 = vmatprep.subr.bf16.mxu0 %v4982_v24  ;;  %3582 = vmatprep.subr.bf16.mxu1 %v4984_v25  ;;  %v5047_v6 = vld [vmem:[#allocation5 + $0x208] ss:$16 sps:$4 sm:$0xff]   ;;  %v5052_v7 = vld [vmem:[#allocation5 + $0x224] ss:$16 sps:$4 sm:$0xff]   ;;  %v5055_v8 = vld [vmem:[#allocation5 + $0x22c] ss:$16 sps:$4 sm:$0xff]  }
  0x73   :  { %v5050_v9 = vld [vmem:[#allocation5 + $0x220] ss:$16 sps:$4 sm:$0xff]   ;;  %v5053_v10 = vld [vmem:[#allocation5 + $0x228] ss:$16 sps:$4 sm:$0xff]   ;;  %v5058_v11 = vld [vmem:[#allocation5 + $0x244] ss:$16 sps:$4 sm:$0xff]  }
  0x74   :  { %v5061_v12 = vld [vmem:[#allocation5 + $0x24c] ss:$16 sps:$4 sm:$0xff]   ;;  %v5056_v13 = vld [vmem:[#allocation5 + $0x240] ss:$16 sps:$4 sm:$0xff]   ;;  %v5059_v14 = vld [vmem:[#allocation5 + $0x248] ss:$16 sps:$4 sm:$0xff]  }
  0x75   :  { %3255 = vmatpush1.bf16.msra.mxu0 %v4986_v26  ;;  %3583 = vmatpush1.bf16.msra.mxu1 %v4987_v27  ;;  %v5064_v15 = vld [vmem:[#allocation5 + $0x264] ss:$16 sps:$4 sm:$0xff]   ;;  %v5067_v16 = vld [vmem:[#allocation5 + $0x26c] ss:$16 sps:$4 sm:$0xff]   ;;  %v5062_v17 = vld [vmem:[#allocation5 + $0x260] ss:$16 sps:$4 sm:$0xff]  }
  0x76   :  { %3256 = vmatprep.subr.bf16.mxu0 %v4988_v28  ;;  %3584 = vmatprep.subr.bf16.mxu1 %v4990_v29  ;;  %v5065_v18 = vld [vmem:[#allocation5 + $0x268] ss:$16 sps:$4 sm:$0xff]   ;;  %v5070_v19 = vld [vmem:[#allocation5 + $0x284] ss:$16 sps:$4 sm:$0xff]   ;;  %v5073_v20 = vld [vmem:[#allocation5 + $0x28c] ss:$16 sps:$4 sm:$0xff]  }
  0x77   :  { %v5068_v21 = vld [vmem:[#allocation5 + $0x280] ss:$16 sps:$4 sm:$0xff]   ;;  %v5071_v22 = vld [vmem:[#allocation5 + $0x288] ss:$16 sps:$4 sm:$0xff]   ;;  %v5076_v23 = vld [vmem:[#allocation5 + $0x2a4] ss:$16 sps:$4 sm:$0xff]  }
  0x78   :  { %v5079_v24 = vld [vmem:[#allocation5 + $0x2ac] ss:$16 sps:$4 sm:$0xff]   ;;  %v5074_v25 = vld [vmem:[#allocation5 + $0x2a0] ss:$16 sps:$4 sm:$0xff]   ;;  %v5077_v26 = vld [vmem:[#allocation5 + $0x2a8] ss:$16 sps:$4 sm:$0xff]  }
  0x79   :  { %3257 = vmatpush1.bf16.msra.mxu0 %v4992_v30  ;;  %3585 = vmatpush1.bf16.msra.mxu1 %v4993_v31  ;;  %v5082_v27 = vld [vmem:[#allocation5 + $0x2c4] ss:$16 sps:$4 sm:$0xff]   ;;  %v5085_v28 = vld [vmem:[#allocation5 + $0x2cc] ss:$16 sps:$4 sm:$0xff]   ;;  %v5080_v31 = vld [vmem:[#allocation5 + $0x2c0] ss:$16 sps:$4 sm:$0xff]  }
  0x7a   :  { %3258 = vmatprep.subr.bf16.mxu0 %v4994_v32  ;;  %3586 = vmatprep.subr.bf16.mxu1 %v4996_v33  ;;  %v6002_v29 = vld [vmem:[#allocation2 + $0x8] sm:$0xff]  ;;  %v5088_v33 = vld [vmem:[#allocation5 + $0x2e4] ss:$16 sps:$4 sm:$0xff]   ;;  %s4260_s28 = sshll.u32 %s5911_s4, 4  ;;  %s4261_s28 = int_to_ptr.vmem [resolvable:$true] %s4260_s28 }
  0x7b   :  { %v4274_v30 = vcombine.high %v6002_v29, %v6002_v29  ;;  %v5083_v32 = vld [vmem:[#allocation5 + $0x2c8] ss:$16 sps:$4 sm:$0xff]   ;;  %v5109_v46 = vld [vmem:[#allocation5 + $0x34c] ss:$16 sps:$4 sm:$0xff]   ;;  %s5872_s29 = scalar_lea.vmem %s4261_s28, 128  ;;  %p5877_p13 = scmp.lt.s32.totalorder %s4261_s28, %s4261_s28 }
  0x7c   :  { %v5107_v48 = vld [vmem:[#allocation5 + $0x348] ss:$16 sps:$4 sm:$0xff]   ;;  %p5873_p12 = scmp.ne.s32.totalorder %s4261_s28, %s5872_s29  ;;  %p5878_p0 = scmp.lt.s32.totalorder %s5872_s29, %s5872_s29 }
  0x7d   :  { %3259 = vmatpush1.bf16.msra.mxu0 %v4998_v34  ;;  %3587 = vmatpush1.bf16.msra.mxu1 %v4999_v35  ;;  %v5091_v34 = vld [vmem:[#allocation5 + $0x2ec] ss:$16 sps:$4 sm:$0xff]   ;;  %v5086_v35 = vld [vmem:[#allocation5 + $0x2e0] ss:$16 sps:$4 sm:$0xff]  }
  0x7e   :  { %3260 = vmatprep.subr.bf16.mxu0 %v5000_v36  ;;  %3588 = vmatprep.subr.bf16.mxu1 %v5002_v37  ;;  %v5089_v36 = vld [vmem:[#allocation5 + $0x2e8] ss:$16 sps:$4 sm:$0xff]   ;;  %v5094_v37 = vld [vmem:[#allocation5 + $0x304] ss:$16 sps:$4 sm:$0xff]   ;;  %p5879_p1 = por %p5878_p0, %p5877_p13 }
  0x80   :  { %p5880_p2 = pnand %p5879_p1, %p5873_p12 }
  0x81   :  { %3261 = vmatpush1.bf16.msra.mxu0 %v5004_v38  ;;  %3589 = vmatpush1.bf16.msra.mxu1 %v5005_v39  ;;  %v5097_v38 = vld [vmem:[#allocation5 + $0x30c] ss:$16 sps:$4 sm:$0xff]   ;;  %v5092_v39 = vld [vmem:[#allocation5 + $0x300] ss:$16 sps:$4 sm:$0xff]  }
  0x82   :  { %3262 = vmatprep.subr.bf16.mxu0 %v5006_v40  ;;  %3590 = vmatprep.subr.bf16.mxu1 %v5008_v41  ;;  %v5095_v40 = vld [vmem:[#allocation5 + $0x308] ss:$16 sps:$4 sm:$0xff]   ;;  %v5100_v41 = vld [vmem:[#allocation5 + $0x324] ss:$16 sps:$4 sm:$0xff]  }
  0x85   :  { %3263 = vmatpush1.bf16.msra.mxu0 %v5010_v42  ;;  %3591 = vmatpush1.bf16.msra.mxu1 %v5011_v43  ;;  %v5103_v42 = vld [vmem:[#allocation5 + $0x32c] ss:$16 sps:$4 sm:$0xff]   ;;  %v5098_v43 = vld [vmem:[#allocation5 + $0x320] ss:$16 sps:$4 sm:$0xff]  }
  0x86   :  { %3264 = vmatprep.subr.bf16.mxu0 %v5012_v44  ;;  %3592 = vmatprep.subr.bf16.mxu1 %v5014_v45  ;;  %v5101_v44 = vld [vmem:[#allocation5 + $0x328] ss:$16 sps:$4 sm:$0xff]   ;;  %v5106_v45 = vld [vmem:[#allocation5 + $0x344] ss:$16 sps:$4 sm:$0xff]  }
  0x89   :  { %3265 = vmatpush1.bf16.msra.mxu0 %v5016_v47  ;;  %3593 = vmatpush1.bf16.msra.mxu1 %v5017_v49  ;;  %v5104_v47 = vld [vmem:[#allocation5 + $0x340] ss:$16 sps:$4 sm:$0xff]   ;;  %v5112_v49 = vld [vmem:[#allocation5 + $0x364] ss:$16 sps:$4 sm:$0xff]  }
  0x8a   :  { %3266 = vmatprep.subr.bf16.mxu0 %v5018_v50  ;;  %3594 = vmatprep.subr.bf16.mxu1 %v5020_v51  ;;  %v5115_v50 = vld [vmem:[#allocation5 + $0x36c] ss:$16 sps:$4 sm:$0xff]   ;;  %v5110_v51 = vld [vmem:[#allocation5 + $0x360] ss:$16 sps:$4 sm:$0xff]  }
  0x8d   :  { %3267 = vmatpush1.bf16.msra.mxu0 %v5022_v52  ;;  %3595 = vmatpush1.bf16.msra.mxu1 %v5023_v53  ;;  %v5113_v52 = vld [vmem:[#allocation5 + $0x368] ss:$16 sps:$4 sm:$0xff]   ;;  %v5118_v53 = vld [vmem:[#allocation5 + $0x384] ss:$16 sps:$4 sm:$0xff]  }
  0x8e   :  { %3268 = vmatprep.subr.bf16.mxu0 %v5024_v54  ;;  %3596 = vmatprep.subr.bf16.mxu1 %v5026_v55  ;;  %v5121_v54 = vld [vmem:[#allocation5 + $0x38c] ss:$16 sps:$4 sm:$0xff]   ;;  %v5116_v55 = vld [vmem:[#allocation5 + $0x380] ss:$16 sps:$4 sm:$0xff]  }
  0x91   :  { %3269 = vmatpush1.bf16.msra.mxu0 %v5028_v56  ;;  %3597 = vmatpush1.bf16.msra.mxu1 %v5029_v57  ;;  %v5119_v56 = vld [vmem:[#allocation5 + $0x388] ss:$16 sps:$4 sm:$0xff]   ;;  %v5124_v57 = vld [vmem:[#allocation5 + $0x3a4] ss:$16 sps:$4 sm:$0xff]  }
  0x92   :  { %3270 = vmatprep.subr.bf16.mxu0 %v5030_v58  ;;  %3598 = vmatprep.subr.bf16.mxu1 %v5032_v59  ;;  %v5127_v58 = vld [vmem:[#allocation5 + $0x3ac] ss:$16 sps:$4 sm:$0xff]   ;;  %v5122_v59 = vld [vmem:[#allocation5 + $0x3a0] ss:$16 sps:$4 sm:$0xff]  }
  0x95   :  { %3271 = vmatpush1.bf16.msra.mxu0 %v5034_v60  ;;  %3599 = vmatpush1.bf16.msra.mxu1 %v5035_v61  ;;  %v5125_v60 = vld [vmem:[#allocation5 + $0x3a8] ss:$16 sps:$4 sm:$0xff]   ;;  %v5130_v61 = vld [vmem:[#allocation5 + $0x3c4] ss:$16 sps:$4 sm:$0xff]  }
  0x96   :  { %3272 = vmatprep.subr.bf16.mxu0 %v5036_v62  ;;  %3600 = vmatprep.subr.bf16.mxu1 %v5038_v63  ;;  %v5133_v62 = vld [vmem:[#allocation5 + $0x3cc] ss:$16 sps:$4 sm:$0xff]   ;;  %v5128_v63 = vld [vmem:[#allocation5 + $0x3c0] ss:$16 sps:$4 sm:$0xff]  }
  0x99   :  { %3273 = vmatpush1.bf16.msra.mxu0 %v5040_v0  ;;  %3601 = vmatpush1.bf16.msra.mxu1 %v5041_v1  ;;  %v5131_v0 = vld [vmem:[#allocation5 + $0x3c8] ss:$16 sps:$4 sm:$0xff]   ;;  %v5136_v1 = vld [vmem:[#allocation5 + $0x3e4] ss:$16 sps:$4 sm:$0xff]  }
  0x9a   :  { %3283 = vmatprep.subr.bf16.mxu0 %v5046_v2  ;;  %3611 = vmatprep.subr.bf16.mxu1 %v5049_v3  ;;  %v5139_v2 = vld [vmem:[#allocation5 + $0x3ec] ss:$16 sps:$4 sm:$0xff]   ;;  %v5134_v3 = vld [vmem:[#allocation5 + $0x3e0] ss:$16 sps:$4 sm:$0xff]  }
  0x9c   :  { %3275 = vmatmul.mubr.bf16.vlgmr.msra.gmra.mrb[0].mxu0 %v4271_v4  ;;  %3603 = vmatmul.mubr.bf16.vlgmr.msra.gmra.mrb[0].mxu1 %v4271_v4  ;;  %v5137_v4 = vld [vmem:[#allocation5 + $0x3e8] ss:$16 sps:$4 sm:$0xff]  }
  0x9d   :  { %3284 = vmatpush1.bf16.msra.mxu0 %v5044_v5  ;;  %3612 = vmatpush1.bf16.msra.mxu1 %v5047_v6  ;;  %v5144_v5 = vld [vmem:[#allocation5 + $0x404] ss:$16 sps:$4 sm:$0xff]   ;;  %v5147_v6 = vld [vmem:[#allocation5 + $0x40c] ss:$16 sps:$4 sm:$0xff]  }
  0x9e   :  { %3285 = vmatprep.subr.bf16.mxu0 %v5052_v7  ;;  %3613 = vmatprep.subr.bf16.mxu1 %v5055_v8  ;;  %v4273_v7 = vcombine.low %v6002_v29, %v6002_v29  ;;  %v5142_v8 = vld [vmem:[#allocation5 + $0x400] ss:$16 sps:$4 sm:$0xff]   ;;  %v5177_v29 = vld [vmem:[#allocation5 + $0x4ac] ss:$16 sps:$4 sm:$0xff]  }
  0x9f   :  { %3315 = vmatprep.mubr.bf16.mxu0 %v4274_v30  ;;  %3643 = vmatprep.mubr.bf16.mxu1 %v4274_v30  ;;  %v5172_v30 = vld [vmem:[#allocation5 + $0x4a0] ss:$16 sps:$4 sm:$0xff]  }
  0xa1   :  { %3286 = vmatpush1.bf16.msra.mxu0 %v5050_v9  ;;  %3614 = vmatpush1.bf16.msra.mxu1 %v5053_v10  ;;  %v5145_v9 = vld [vmem:[#allocation5 + $0x408] ss:$16 sps:$4 sm:$0xff]   ;;  %v5150_v10 = vld [vmem:[#allocation5 + $0x424] ss:$16 sps:$4 sm:$0xff]  }
  0xa2   :  { %3287 = vmatprep.subr.bf16.mxu0 %v5058_v11  ;;  %3615 = vmatprep.subr.bf16.mxu1 %v5061_v12  ;;  %v6008_v11 = vld [vmem:[#allocation2 + $0x10] sm:$0xff]  ;;  %v5153_v12 = vld [vmem:[#allocation5 + $0x42c] ss:$16 sps:$4 sm:$0xff]  }
  0xa5   :  { %3288 = vmatpush1.bf16.msra.mxu0 %v5056_v13  ;;  %3616 = vmatpush1.bf16.msra.mxu1 %v5059_v14  ;;  %v4276_v13 = vcombine.high %v6008_v11, %v6008_v11  ;;  %v5148_v14 = vld [vmem:[#allocation5 + $0x420] ss:$16 sps:$4 sm:$0xff]  }
  0xa6   :  { %3289 = vmatprep.subr.bf16.mxu0 %v5064_v15  ;;  %3617 = vmatprep.subr.bf16.mxu1 %v5067_v16  ;;  %v5151_v15 = vld [vmem:[#allocation5 + $0x428] ss:$16 sps:$4 sm:$0xff]   ;;  %v5156_v16 = vld [vmem:[#allocation5 + $0x444] ss:$16 sps:$4 sm:$0xff]  }
  0xa9   :  { %3290 = vmatpush1.bf16.msra.mxu0 %v5062_v17  ;;  %3618 = vmatpush1.bf16.msra.mxu1 %v5065_v18  ;;  %v5159_v17 = vld [vmem:[#allocation5 + $0x44c] ss:$16 sps:$4 sm:$0xff]   ;;  %v5154_v18 = vld [vmem:[#allocation5 + $0x440] ss:$16 sps:$4 sm:$0xff]  }
  0xaa   :  { %3291 = vmatprep.subr.bf16.mxu0 %v5070_v19  ;;  %3619 = vmatprep.subr.bf16.mxu1 %v5073_v20  ;;  %v5157_v19 = vld [vmem:[#allocation5 + $0x448] ss:$16 sps:$4 sm:$0xff]   ;;  %v5162_v20 = vld [vmem:[#allocation5 + $0x464] ss:$16 sps:$4 sm:$0xff]  }
  0xad   :  { %3292 = vmatpush1.bf16.msra.mxu0 %v5068_v21  ;;  %3620 = vmatpush1.bf16.msra.mxu1 %v5071_v22  ;;  %v5165_v21 = vld [vmem:[#allocation5 + $0x46c] ss:$16 sps:$4 sm:$0xff]   ;;  %v5160_v22 = vld [vmem:[#allocation5 + $0x460] ss:$16 sps:$4 sm:$0xff]  }
  0xae   :  { %3293 = vmatprep.subr.bf16.mxu0 %v5076_v23  ;;  %3621 = vmatprep.subr.bf16.mxu1 %v5079_v24  ;;  %v5163_v23 = vld [vmem:[#allocation5 + $0x468] ss:$16 sps:$4 sm:$0xff]   ;;  %v5168_v24 = vld [vmem:[#allocation5 + $0x484] ss:$16 sps:$4 sm:$0xff]  }
  0xb1   :  { %3294 = vmatpush1.bf16.msra.mxu0 %v5074_v25  ;;  %3622 = vmatpush1.bf16.msra.mxu1 %v5077_v26  ;;  %v5171_v25 = vld [vmem:[#allocation5 + $0x48c] ss:$16 sps:$4 sm:$0xff]   ;;  %v5166_v26 = vld [vmem:[#allocation5 + $0x480] ss:$16 sps:$4 sm:$0xff]  }
  0xb2   :  { %3295 = vmatprep.subr.bf16.mxu0 %v5082_v27  ;;  %3623 = vmatprep.subr.bf16.mxu1 %v5085_v28  ;;  %v5169_v27 = vld [vmem:[#allocation5 + $0x488] ss:$16 sps:$4 sm:$0xff]   ;;  %v5174_v28 = vld [vmem:[#allocation5 + $0x4a4] ss:$16 sps:$4 sm:$0xff]  }
  0xb5   :  { %3296 = vmatpush1.bf16.msra.mxu0 %v5080_v31  ;;  %3624 = vmatpush1.bf16.msra.mxu1 %v5083_v32  ;;  %v5175_v31 = vld [vmem:[#allocation5 + $0x4a8] ss:$16 sps:$4 sm:$0xff]   ;;  %v5180_v32 = vld [vmem:[#allocation5 + $0x4c4] ss:$16 sps:$4 sm:$0xff]  }
  0xb6   :  { %3297 = vmatprep.subr.bf16.mxu0 %v5088_v33  ;;  %3625 = vmatprep.subr.bf16.mxu1 %v5091_v34  ;;  %v5183_v33 = vld [vmem:[#allocation5 + $0x4cc] ss:$16 sps:$4 sm:$0xff]   ;;  %v5178_v34 = vld [vmem:[#allocation5 + $0x4c0] ss:$16 sps:$4 sm:$0xff]  }
  0xb9   :  { %3298 = vmatpush1.bf16.msra.mxu0 %v5086_v35  ;;  %3626 = vmatpush1.bf16.msra.mxu1 %v5089_v36  ;;  %v5181_v35 = vld [vmem:[#allocation5 + $0x4c8] ss:$16 sps:$4 sm:$0xff]   ;;  %v5186_v36 = vld [vmem:[#allocation5 + $0x4e4] ss:$16 sps:$4 sm:$0xff]  }
  0xba   :  { %3299 = vmatprep.subr.bf16.mxu0 %v5094_v37  ;;  %3627 = vmatprep.subr.bf16.mxu1 %v5097_v38  ;;  %v5189_v37 = vld [vmem:[#allocation5 + $0x4ec] ss:$16 sps:$4 sm:$0xff]   ;;  %v5184_v38 = vld [vmem:[#allocation5 + $0x4e0] ss:$16 sps:$4 sm:$0xff]  }
  0xbd   :  { %3300 = vmatpush1.bf16.msra.mxu0 %v5092_v39  ;;  %3628 = vmatpush1.bf16.msra.mxu1 %v5095_v40  ;;  %v5187_v39 = vld [vmem:[#allocation5 + $0x4e8] ss:$16 sps:$4 sm:$0xff]   ;;  %v5192_v40 = vld [vmem:[#allocation5 + $0x504] ss:$16 sps:$4 sm:$0xff]  }
  0xbe   :  { %3301 = vmatprep.subr.bf16.mxu0 %v5100_v41  ;;  %3629 = vmatprep.subr.bf16.mxu1 %v5103_v42  ;;  %v5195_v41 = vld [vmem:[#allocation5 + $0x50c] ss:$16 sps:$4 sm:$0xff]   ;;  %v5190_v42 = vld [vmem:[#allocation5 + $0x500] ss:$16 sps:$4 sm:$0xff]  }
  0xc1   :  { %3302 = vmatpush1.bf16.msra.mxu0 %v5098_v43  ;;  %3630 = vmatpush1.bf16.msra.mxu1 %v5101_v44  ;;  %v5193_v43 = vld [vmem:[#allocation5 + $0x508] ss:$16 sps:$4 sm:$0xff]   ;;  %v5198_v44 = vld [vmem:[#allocation5 + $0x524] ss:$16 sps:$4 sm:$0xff]  }
  0xc2   :  { %3303 = vmatprep.subr.bf16.mxu0 %v5106_v45  ;;  %3631 = vmatprep.subr.bf16.mxu1 %v5109_v46  ;;  %v5201_v45 = vld [vmem:[#allocation5 + $0x52c] ss:$16 sps:$4 sm:$0xff]   ;;  %v5196_v46 = vld [vmem:[#allocation5 + $0x520] ss:$16 sps:$4 sm:$0xff]  }
  0xc5   :  { %3304 = vmatpush1.bf16.msra.mxu0 %v5104_v47  ;;  %3632 = vmatpush1.bf16.msra.mxu1 %v5107_v48  ;;  %v5199_v47 = vld [vmem:[#allocation5 + $0x528] ss:$16 sps:$4 sm:$0xff]   ;;  %v5204_v48 = vld [vmem:[#allocation5 + $0x544] ss:$16 sps:$4 sm:$0xff]  }
  0xc6   :  { %3305 = vmatprep.subr.bf16.mxu0 %v5112_v49  ;;  %3633 = vmatprep.subr.bf16.mxu1 %v5115_v50  ;;  %v5207_v49 = vld [vmem:[#allocation5 + $0x54c] ss:$16 sps:$4 sm:$0xff]   ;;  %v5202_v50 = vld [vmem:[#allocation5 + $0x540] ss:$16 sps:$4 sm:$0xff]  }
  0xc9   :  { %3306 = vmatpush1.bf16.msra.mxu0 %v5110_v51  ;;  %3634 = vmatpush1.bf16.msra.mxu1 %v5113_v52  ;;  %v5205_v51 = vld [vmem:[#allocation5 + $0x548] ss:$16 sps:$4 sm:$0xff]   ;;  %v5210_v52 = vld [vmem:[#allocation5 + $0x564] ss:$16 sps:$4 sm:$0xff]  }
  0xca   :  { %3307 = vmatprep.subr.bf16.mxu0 %v5118_v53  ;;  %3635 = vmatprep.subr.bf16.mxu1 %v5121_v54  ;;  %v5213_v53 = vld [vmem:[#allocation5 + $0x56c] ss:$16 sps:$4 sm:$0xff]   ;;  %v5208_v54 = vld [vmem:[#allocation5 + $0x560] ss:$16 sps:$4 sm:$0xff]  }
  0xcd   :  { %3308 = vmatpush1.bf16.msra.mxu0 %v5116_v55  ;;  %3636 = vmatpush1.bf16.msra.mxu1 %v5119_v56  ;;  %v5211_v55 = vld [vmem:[#allocation5 + $0x568] ss:$16 sps:$4 sm:$0xff]   ;;  %v5216_v56 = vld [vmem:[#allocation5 + $0x584] ss:$16 sps:$4 sm:$0xff]  }
  0xce   :  { %3309 = vmatprep.subr.bf16.mxu0 %v5124_v57  ;;  %3637 = vmatprep.subr.bf16.mxu1 %v5127_v58  ;;  %v5219_v57 = vld [vmem:[#allocation5 + $0x58c] ss:$16 sps:$4 sm:$0xff]   ;;  %v5214_v58 = vld [vmem:[#allocation5 + $0x580] ss:$16 sps:$4 sm:$0xff]  }
  0xd1   :  { %3310 = vmatpush1.bf16.msra.mxu0 %v5122_v59  ;;  %3638 = vmatpush1.bf16.msra.mxu1 %v5125_v60  ;;  %v5217_v59 = vld [vmem:[#allocation5 + $0x588] ss:$16 sps:$4 sm:$0xff]   ;;  %v5222_v60 = vld [vmem:[#allocation5 + $0x5a4] ss:$16 sps:$4 sm:$0xff]  }
  0xd2   :  { %3311 = vmatprep.subr.bf16.mxu0 %v5130_v61  ;;  %3639 = vmatprep.subr.bf16.mxu1 %v5133_v62  ;;  %v5225_v61 = vld [vmem:[#allocation5 + $0x5ac] ss:$16 sps:$4 sm:$0xff]   ;;  %v5220_v62 = vld [vmem:[#allocation5 + $0x5a0] ss:$16 sps:$4 sm:$0xff]  }
  0xd5   :  { %3312 = vmatpush1.bf16.msra.mxu0 %v5128_v63  ;;  %3640 = vmatpush1.bf16.msra.mxu1 %v5131_v0  ;;  %v5223_v63 = vld [vmem:[#allocation5 + $0x5a8] ss:$16 sps:$4 sm:$0xff]   ;;  %v5228_v0 = vld [vmem:[#allocation5 + $0x5c4] ss:$16 sps:$4 sm:$0xff]  }
  0xd6   :  { %3313 = vmatprep.subr.bf16.mxu0 %v5136_v1  ;;  %3641 = vmatprep.subr.bf16.mxu1 %v5139_v2  ;;  %v5231_v1 = vld [vmem:[#allocation5 + $0x5cc] ss:$16 sps:$4 sm:$0xff]   ;;  %v5226_v2 = vld [vmem:[#allocation5 + $0x5c0] ss:$16 sps:$4 sm:$0xff]  }
  0xd9   :  { %3314 = vmatpush1.bf16.msra.mxu0 %v5134_v3  ;;  %3642 = vmatpush1.bf16.msra.mxu1 %v5137_v4  ;;  %v5229_v3 = vld [vmem:[#allocation5 + $0x5c8] ss:$16 sps:$4 sm:$0xff]   ;;  %v5234_v4 = vld [vmem:[#allocation5 + $0x5e4] ss:$16 sps:$4 sm:$0xff]  }
  0xda   :  { %3324 = vmatprep.subr.bf16.mxu0 %v5144_v5  ;;  %3652 = vmatprep.subr.bf16.mxu1 %v5147_v6  ;;  %v5237_v5 = vld [vmem:[#allocation5 + $0x5ec] ss:$16 sps:$4 sm:$0xff]   ;;  %v5232_v6 = vld [vmem:[#allocation5 + $0x5e0] ss:$16 sps:$4 sm:$0xff]  }
  0xdc   :  { %3316 = vmatmul.mubr.bf16.vlgmr.msra.gmra.mrb[0].mxu0 %v4273_v7  ;;  %3644 = vmatmul.mubr.bf16.vlgmr.msra.gmra.mrb[0].mxu1 %v4273_v7  ;;  %v5235_v7 = vld [vmem:[#allocation5 + $0x5e8] ss:$16 sps:$4 sm:$0xff]  }
  0xdd   :  { %3325 = vmatpush1.bf16.msra.mxu0 %v5142_v8  ;;  %3653 = vmatpush1.bf16.msra.mxu1 %v5145_v9  ;;  %v5242_v8 = vld [vmem:[#allocation5 + $0x604] ss:$16 sps:$4 sm:$0xff]   ;;  %v5245_v9 = vld [vmem:[#allocation5 + $0x60c] ss:$16 sps:$4 sm:$0xff]  }
  0xde   :  { %3326 = vmatprep.subr.bf16.mxu0 %v5150_v10  ;;  %3654 = vmatprep.subr.bf16.mxu1 %v5153_v12  ;;  %v5240_v10 = vld [vmem:[#allocation5 + $0x600] ss:$16 sps:$4 sm:$0xff]   ;;  %v4275_v12 = vcombine.low %v6008_v11, %v6008_v11  ;;  %v5257_v11 = vld [vmem:[#allocation5 + $0x64c] ss:$16 sps:$4 sm:$0xff]  }
  0xdf   :  { %3356 = vmatprep.mubr.bf16.mxu0 %v4276_v13  ;;  %3684 = vmatprep.mubr.bf16.mxu1 %v4276_v13  ;;  %v5243_v13 = vld [vmem:[#allocation5 + $0x608] ss:$16 sps:$4 sm:$0xff]  }
  0xe1   :  { %3327 = vmatpush1.bf16.msra.mxu0 %v5148_v14  ;;  %3655 = vmatpush1.bf16.msra.mxu1 %v5151_v15  ;;  %v6014_v14 = vld [vmem:[#allocation2 + $0x18] sm:$0xff]  ;;  %v5248_v15 = vld [vmem:[#allocation5 + $0x624] ss:$16 sps:$4 sm:$0xff]  }
  0xe2   :  { %3328 = vmatprep.subr.bf16.mxu0 %v5156_v16  ;;  %3656 = vmatprep.subr.bf16.mxu1 %v5159_v17  ;;  %v5251_v16 = vld [vmem:[#allocation5 + $0x62c] ss:$16 sps:$4 sm:$0xff]   ;;  %v4278_v17 = vcombine.high %v6014_v14, %v6014_v14 }
  0xe5   :  { %3329 = vmatpush1.bf16.msra.mxu0 %v5154_v18  ;;  %3657 = vmatpush1.bf16.msra.mxu1 %v5157_v19  ;;  %v5246_v18 = vld [vmem:[#allocation5 + $0x620] ss:$16 sps:$4 sm:$0xff]   ;;  %v5249_v19 = vld [vmem:[#allocation5 + $0x628] ss:$16 sps:$4 sm:$0xff]  }
  0xe6   :  { %3330 = vmatprep.subr.bf16.mxu0 %v5162_v20  ;;  %3658 = vmatprep.subr.bf16.mxu1 %v5165_v21  ;;  %v5254_v20 = vld [vmem:[#allocation5 + $0x644] ss:$16 sps:$4 sm:$0xff]   ;;  %v5252_v21 = vld [vmem:[#allocation5 + $0x640] ss:$16 sps:$4 sm:$0xff]  }
  0xe9   :  { %3331 = vmatpush1.bf16.msra.mxu0 %v5160_v22  ;;  %3659 = vmatpush1.bf16.msra.mxu1 %v5163_v23  ;;  %v5255_v22 = vld [vmem:[#allocation5 + $0x648] ss:$16 sps:$4 sm:$0xff]   ;;  %v5260_v23 = vld [vmem:[#allocation5 + $0x664] ss:$16 sps:$4 sm:$0xff]  }
  0xea   :  { %3332 = vmatprep.subr.bf16.mxu0 %v5168_v24  ;;  %3660 = vmatprep.subr.bf16.mxu1 %v5171_v25  ;;  %v5263_v24 = vld [vmem:[#allocation5 + $0x66c] ss:$16 sps:$4 sm:$0xff]   ;;  %v5258_v25 = vld [vmem:[#allocation5 + $0x660] ss:$16 sps:$4 sm:$0xff]  }
  0xed   :  { %3333 = vmatpush1.bf16.msra.mxu0 %v5166_v26  ;;  %3661 = vmatpush1.bf16.msra.mxu1 %v5169_v27  ;;  %v5261_v26 = vld [vmem:[#allocation5 + $0x668] ss:$16 sps:$4 sm:$0xff]   ;;  %v5266_v27 = vld [vmem:[#allocation5 + $0x684] ss:$16 sps:$4 sm:$0xff]  }
  0xee   :  { %3334 = vmatprep.subr.bf16.mxu0 %v5174_v28  ;;  %3662 = vmatprep.subr.bf16.mxu1 %v5177_v29  ;;  %v5269_v28 = vld [vmem:[#allocation5 + $0x68c] ss:$16 sps:$4 sm:$0xff]   ;;  %v5264_v29 = vld [vmem:[#allocation5 + $0x680] ss:$16 sps:$4 sm:$0xff]  }
  0xf1   :  { %3335 = vmatpush1.bf16.msra.mxu0 %v5172_v30  ;;  %3663 = vmatpush1.bf16.msra.mxu1 %v5175_v31  ;;  %v5267_v30 = vld [vmem:[#allocation5 + $0x688] ss:$16 sps:$4 sm:$0xff]   ;;  %v5272_v31 = vld [vmem:[#allocation5 + $0x6a4] ss:$16 sps:$4 sm:$0xff]  }
  0xf2   :  { %3336 = vmatprep.subr.bf16.mxu0 %v5180_v32  ;;  %3664 = vmatprep.subr.bf16.mxu1 %v5183_v33  ;;  %v5275_v32 = vld [vmem:[#allocation5 + $0x6ac] ss:$16 sps:$4 sm:$0xff]   ;;  %v5270_v33 = vld [vmem:[#allocation5 + $0x6a0] ss:$16 sps:$4 sm:$0xff]  }
  0xf5   :  { %3337 = vmatpush1.bf16.msra.mxu0 %v5178_v34  ;;  %3665 = vmatpush1.bf16.msra.mxu1 %v5181_v35  ;;  %v5273_v34 = vld [vmem:[#allocation5 + $0x6a8] ss:$16 sps:$4 sm:$0xff]   ;;  %v5278_v35 = vld [vmem:[#allocation5 + $0x6c4] ss:$16 sps:$4 sm:$0xff]  }
  0xf6   :  { %3338 = vmatprep.subr.bf16.mxu0 %v5186_v36  ;;  %3666 = vmatprep.subr.bf16.mxu1 %v5189_v37  ;;  %v5281_v36 = vld [vmem:[#allocation5 + $0x6cc] ss:$16 sps:$4 sm:$0xff]   ;;  %v5276_v37 = vld [vmem:[#allocation5 + $0x6c0] ss:$16 sps:$4 sm:$0xff]  }
  0xf9   :  { %3339 = vmatpush1.bf16.msra.mxu0 %v5184_v38  ;;  %3667 = vmatpush1.bf16.msra.mxu1 %v5187_v39  ;;  %v5279_v38 = vld [vmem:[#allocation5 + $0x6c8] ss:$16 sps:$4 sm:$0xff]   ;;  %v5284_v39 = vld [vmem:[#allocation5 + $0x6e4] ss:$16 sps:$4 sm:$0xff]  }
  0xfa   :  { %3340 = vmatprep.subr.bf16.mxu0 %v5192_v40  ;;  %3668 = vmatprep.subr.bf16.mxu1 %v5195_v41  ;;  %v5287_v40 = vld [vmem:[#allocation5 + $0x6ec] ss:$16 sps:$4 sm:$0xff]   ;;  %v5282_v41 = vld [vmem:[#allocation5 + $0x6e0] ss:$16 sps:$4 sm:$0xff]  }
  0xfd   :  { %3341 = vmatpush1.bf16.msra.mxu0 %v5190_v42  ;;  %3669 = vmatpush1.bf16.msra.mxu1 %v5193_v43  ;;  %v5285_v42 = vld [vmem:[#allocation5 + $0x6e8] ss:$16 sps:$4 sm:$0xff]   ;;  %v5290_v43 = vld [vmem:[#allocation5 + $0x704] ss:$16 sps:$4 sm:$0xff]  }
  0xfe   :  { %3342 = vmatprep.subr.bf16.mxu0 %v5198_v44  ;;  %3670 = vmatprep.subr.bf16.mxu1 %v5201_v45  ;;  %v5293_v44 = vld [vmem:[#allocation5 + $0x70c] ss:$16 sps:$4 sm:$0xff]   ;;  %v5288_v45 = vld [vmem:[#allocation5 + $0x700] ss:$16 sps:$4 sm:$0xff]  }
 0x101   :  { %3343 = vmatpush1.bf16.msra.mxu0 %v5196_v46  ;;  %3671 = vmatpush1.bf16.msra.mxu1 %v5199_v47  ;;  %v5291_v46 = vld [vmem:[#allocation5 + $0x708] ss:$16 sps:$4 sm:$0xff]   ;;  %v5296_v47 = vld [vmem:[#allocation5 + $0x724] ss:$16 sps:$4 sm:$0xff]  }
 0x102   :  { %3344 = vmatprep.subr.bf16.mxu0 %v5204_v48  ;;  %3672 = vmatprep.subr.bf16.mxu1 %v5207_v49  ;;  %v5299_v48 = vld [vmem:[#allocation5 + $0x72c] ss:$16 sps:$4 sm:$0xff]   ;;  %v5294_v49 = vld [vmem:[#allocation5 + $0x720] ss:$16 sps:$4 sm:$0xff]  }
 0x105   :  { %3345 = vmatpush1.bf16.msra.mxu0 %v5202_v50  ;;  %3673 = vmatpush1.bf16.msra.mxu1 %v5205_v51  ;;  %v5297_v50 = vld [vmem:[#allocation5 + $0x728] ss:$16 sps:$4 sm:$0xff]   ;;  %v5302_v51 = vld [vmem:[#allocation5 + $0x744] ss:$16 sps:$4 sm:$0xff]  }
 0x106   :  { %3346 = vmatprep.subr.bf16.mxu0 %v5210_v52  ;;  %3674 = vmatprep.subr.bf16.mxu1 %v5213_v53  ;;  %v5305_v52 = vld [vmem:[#allocation5 + $0x74c] ss:$16 sps:$4 sm:$0xff]   ;;  %v5300_v53 = vld [vmem:[#allocation5 + $0x740] ss:$16 sps:$4 sm:$0xff]  }
 0x109   :  { %3347 = vmatpush1.bf16.msra.mxu0 %v5208_v54  ;;  %3675 = vmatpush1.bf16.msra.mxu1 %v5211_v55  ;;  %v5303_v54 = vld [vmem:[#allocation5 + $0x748] ss:$16 sps:$4 sm:$0xff]   ;;  %v5308_v55 = vld [vmem:[#allocation5 + $0x764] ss:$16 sps:$4 sm:$0xff]  }
 0x10a   :  { %3348 = vmatprep.subr.bf16.mxu0 %v5216_v56  ;;  %3676 = vmatprep.subr.bf16.mxu1 %v5219_v57  ;;  %v5311_v56 = vld [vmem:[#allocation5 + $0x76c] ss:$16 sps:$4 sm:$0xff]   ;;  %v5306_v57 = vld [vmem:[#allocation5 + $0x760] ss:$16 sps:$4 sm:$0xff]  }
 0x10d   :  { %3349 = vmatpush1.bf16.msra.mxu0 %v5214_v58  ;;  %3677 = vmatpush1.bf16.msra.mxu1 %v5217_v59  ;;  %v5309_v58 = vld [vmem:[#allocation5 + $0x768] ss:$16 sps:$4 sm:$0xff]   ;;  %v5314_v59 = vld [vmem:[#allocation5 + $0x784] ss:$16 sps:$4 sm:$0xff]  }
 0x10e   :  { %3350 = vmatprep.subr.bf16.mxu0 %v5222_v60  ;;  %3678 = vmatprep.subr.bf16.mxu1 %v5225_v61  ;;  %v5317_v60 = vld [vmem:[#allocation5 + $0x78c] ss:$16 sps:$4 sm:$0xff]   ;;  %v5312_v61 = vld [vmem:[#allocation5 + $0x780] ss:$16 sps:$4 sm:$0xff]  }
 0x111   :  { %3351 = vmatpush1.bf16.msra.mxu0 %v5220_v62  ;;  %3679 = vmatpush1.bf16.msra.mxu1 %v5223_v63  ;;  %v5315_v62 = vld [vmem:[#allocation5 + $0x788] ss:$16 sps:$4 sm:$0xff]   ;;  %v5320_v63 = vld [vmem:[#allocation5 + $0x7a4] ss:$16 sps:$4 sm:$0xff]  }
 0x112   :  { %3352 = vmatprep.subr.bf16.mxu0 %v5228_v0  ;;  %3680 = vmatprep.subr.bf16.mxu1 %v5231_v1  ;;  %v5323_v0 = vld [vmem:[#allocation5 + $0x7ac] ss:$16 sps:$4 sm:$0xff]   ;;  %v5318_v1 = vld [vmem:[#allocation5 + $0x7a0] ss:$16 sps:$4 sm:$0xff]  }
 0x115   :  { %3353 = vmatpush1.bf16.msra.mxu0 %v5226_v2  ;;  %3681 = vmatpush1.bf16.msra.mxu1 %v5229_v3  ;;  %v5321_v2 = vld [vmem:[#allocation5 + $0x7a8] ss:$16 sps:$4 sm:$0xff]   ;;  %v5326_v3 = vld [vmem:[#allocation5 + $0x7c4] ss:$16 sps:$4 sm:$0xff]  }
 0x116   :  { %3354 = vmatprep.subr.bf16.mxu0 %v5234_v4  ;;  %3682 = vmatprep.subr.bf16.mxu1 %v5237_v5  ;;  %v5329_v4 = vld [vmem:[#allocation5 + $0x7cc] ss:$16 sps:$4 sm:$0xff]   ;;  %v5324_v5 = vld [vmem:[#allocation5 + $0x7c0] ss:$16 sps:$4 sm:$0xff]  }
 0x119   :  { %3355 = vmatpush1.bf16.msra.mxu0 %v5232_v6  ;;  %3683 = vmatpush1.bf16.msra.mxu1 %v5235_v7  ;;  %v5327_v6 = vld [vmem:[#allocation5 + $0x7c8] ss:$16 sps:$4 sm:$0xff]   ;;  %v5332_v7 = vld [vmem:[#allocation5 + $0x7e4] ss:$16 sps:$4 sm:$0xff]  }
 0x11a   :  { %3365 = vmatprep.subr.bf16.mxu0 %v5242_v8  ;;  %3693 = vmatprep.subr.bf16.mxu1 %v5245_v9  ;;  %v5335_v8 = vld [vmem:[#allocation5 + $0x7ec] ss:$16 sps:$4 sm:$0xff]   ;;  %v5330_v9 = vld [vmem:[#allocation5 + $0x7e0] ss:$16 sps:$4 sm:$0xff]  }
 0x11c   :  { %3357 = vmatmul.mubr.bf16.vlgmr.msra.gmra.mrb[0].mxu0 %v4275_v12  ;;  %3685 = vmatmul.mubr.bf16.vlgmr.msra.gmra.mrb[0].mxu1 %v4275_v12  ;;  %v5340_v12 = vld [vmem:[#allocation5 + $0x804] ss:$16 sps:$4 sm:$0xff]  }
 0x11d   :  { %3366 = vmatpush1.bf16.msra.mxu0 %v5240_v10  ;;  %3694 = vmatpush1.bf16.msra.mxu1 %v5243_v13  ;;  %v5333_v10 = vld [vmem:[#allocation5 + $0x7e8] ss:$16 sps:$4 sm:$0xff]   ;;  %v5343_v13 = vld [vmem:[#allocation5 + $0x80c] ss:$16 sps:$4 sm:$0xff]  }
 0x11e   :  { %3367 = vmatprep.subr.bf16.mxu0 %v5248_v15  ;;  %3695 = vmatprep.subr.bf16.mxu1 %v5251_v16  ;;  %v5338_v15 = vld [vmem:[#allocation5 + $0x800] ss:$16 sps:$4 sm:$0xff]   ;;  %v4277_v16 = vcombine.low %v6014_v14, %v6014_v14  ;;  %v5352_v14 = vld [vmem:[#allocation5 + $0x844] ss:$16 sps:$4 sm:$0xff]  }
 0x11f   :  { %3397 = vmatprep.mubr.bf16.mxu0 %v4278_v17  ;;  %3725 = vmatprep.mubr.bf16.mxu1 %v4278_v17  ;;  %v6020_v17 = vld [vmem:[#allocation2 + $0x20] sm:$0xff] }
 0x121   :  { %3368 = vmatpush1.bf16.msra.mxu0 %v5246_v18  ;;  %3696 = vmatpush1.bf16.msra.mxu1 %v5249_v19  ;;  %v5341_v18 = vld [vmem:[#allocation5 + $0x808] ss:$16 sps:$4 sm:$0xff]   ;;  %v5346_v19 = vld [vmem:[#allocation5 + $0x824] ss:$16 sps:$4 sm:$0xff]  }
 0x122   :  { %3369 = vmatprep.subr.bf16.mxu0 %v5254_v20  ;;  %3697 = vmatprep.subr.bf16.mxu1 %v5257_v11  ;;  %v5349_v20 = vld [vmem:[#allocation5 + $0x82c] ss:$16 sps:$4 sm:$0xff]   ;;  %v4280_v11 = vcombine.high %v6020_v17, %v6020_v17 }
 0x125   :  { %3370 = vmatpush1.bf16.msra.mxu0 %v5252_v21  ;;  %3698 = vmatpush1.bf16.msra.mxu1 %v5255_v22  ;;  %v5344_v21 = vld [vmem:[#allocation5 + $0x820] ss:$16 sps:$4 sm:$0xff]   ;;  %v5347_v22 = vld [vmem:[#allocation5 + $0x828] ss:$16 sps:$4 sm:$0xff]  }
 0x126   :  { %3371 = vmatprep.subr.bf16.mxu0 %v5260_v23  ;;  %3699 = vmatprep.subr.bf16.mxu1 %v5263_v24  ;;  %v5355_v23 = vld [vmem:[#allocation5 + $0x84c] ss:$16 sps:$4 sm:$0xff]   ;;  %v5350_v24 = vld [vmem:[#allocation5 + $0x840] ss:$16 sps:$4 sm:$0xff]  }
 0x129   :  { %3372 = vmatpush1.bf16.msra.mxu0 %v5258_v25  ;;  %3700 = vmatpush1.bf16.msra.mxu1 %v5261_v26  ;;  %v5353_v25 = vld [vmem:[#allocation5 + $0x848] ss:$16 sps:$4 sm:$0xff]   ;;  %v5358_v26 = vld [vmem:[#allocation5 + $0x864] ss:$16 sps:$4 sm:$0xff]  }
 0x12a   :  { %3373 = vmatprep.subr.bf16.mxu0 %v5266_v27  ;;  %3701 = vmatprep.subr.bf16.mxu1 %v5269_v28  ;;  %v5361_v27 = vld [vmem:[#allocation5 + $0x86c] ss:$16 sps:$4 sm:$0xff]   ;;  %v5356_v28 = vld [vmem:[#allocation5 + $0x860] ss:$16 sps:$4 sm:$0xff]  }
 0x12d   :  { %3374 = vmatpush1.bf16.msra.mxu0 %v5264_v29  ;;  %3702 = vmatpush1.bf16.msra.mxu1 %v5267_v30  ;;  %v5359_v29 = vld [vmem:[#allocation5 + $0x868] ss:$16 sps:$4 sm:$0xff]   ;;  %v5364_v30 = vld [vmem:[#allocation5 + $0x884] ss:$16 sps:$4 sm:$0xff]  }
 0x12e   :  { %3375 = vmatprep.subr.bf16.mxu0 %v5272_v31  ;;  %3703 = vmatprep.subr.bf16.mxu1 %v5275_v32  ;;  %v5367_v31 = vld [vmem:[#allocation5 + $0x88c] ss:$16 sps:$4 sm:$0xff]   ;;  %v5362_v32 = vld [vmem:[#allocation5 + $0x880] ss:$16 sps:$4 sm:$0xff]  }
 0x131   :  { %3376 = vmatpush1.bf16.msra.mxu0 %v5270_v33  ;;  %3704 = vmatpush1.bf16.msra.mxu1 %v5273_v34  ;;  %v5365_v33 = vld [vmem:[#allocation5 + $0x888] ss:$16 sps:$4 sm:$0xff]   ;;  %v5370_v34 = vld [vmem:[#allocation5 + $0x8a4] ss:$16 sps:$4 sm:$0xff]  }
 0x132   :  { %3377 = vmatprep.subr.bf16.mxu0 %v5278_v35  ;;  %3705 = vmatprep.subr.bf16.mxu1 %v5281_v36  ;;  %v5373_v35 = vld [vmem:[#allocation5 + $0x8ac] ss:$16 sps:$4 sm:$0xff]   ;;  %v5368_v36 = vld [vmem:[#allocation5 + $0x8a0] ss:$16 sps:$4 sm:$0xff]  }
 0x135   :  { %3378 = vmatpush1.bf16.msra.mxu0 %v5276_v37  ;;  %3706 = vmatpush1.bf16.msra.mxu1 %v5279_v38  ;;  %v5371_v37 = vld [vmem:[#allocation5 + $0x8a8] ss:$16 sps:$4 sm:$0xff]   ;;  %v5376_v38 = vld [vmem:[#allocation5 + $0x8c4] ss:$16 sps:$4 sm:$0xff]  }
 0x136   :  { %3379 = vmatprep.subr.bf16.mxu0 %v5284_v39  ;;  %3707 = vmatprep.subr.bf16.mxu1 %v5287_v40  ;;  %v5379_v39 = vld [vmem:[#allocation5 + $0x8cc] ss:$16 sps:$4 sm:$0xff]   ;;  %v5374_v40 = vld [vmem:[#allocation5 + $0x8c0] ss:$16 sps:$4 sm:$0xff]  }
 0x139   :  { %3380 = vmatpush1.bf16.msra.mxu0 %v5282_v41  ;;  %3708 = vmatpush1.bf16.msra.mxu1 %v5285_v42  ;;  %v5377_v41 = vld [vmem:[#allocation5 + $0x8c8] ss:$16 sps:$4 sm:$0xff]   ;;  %v5382_v42 = vld [vmem:[#allocation5 + $0x8e4] ss:$16 sps:$4 sm:$0xff]  }
 0x13a   :  { %3381 = vmatprep.subr.bf16.mxu0 %v5290_v43  ;;  %3709 = vmatprep.subr.bf16.mxu1 %v5293_v44  ;;  %v5385_v43 = vld [vmem:[#allocation5 + $0x8ec] ss:$16 sps:$4 sm:$0xff]   ;;  %v5380_v44 = vld [vmem:[#allocation5 + $0x8e0] ss:$16 sps:$4 sm:$0xff]  }
 0x13d   :  { %3382 = vmatpush1.bf16.msra.mxu0 %v5288_v45  ;;  %3710 = vmatpush1.bf16.msra.mxu1 %v5291_v46  ;;  %v5383_v45 = vld [vmem:[#allocation5 + $0x8e8] ss:$16 sps:$4 sm:$0xff]   ;;  %v5388_v46 = vld [vmem:[#allocation5 + $0x904] ss:$16 sps:$4 sm:$0xff]  }
 0x13e   :  { %3383 = vmatprep.subr.bf16.mxu0 %v5296_v47  ;;  %3711 = vmatprep.subr.bf16.mxu1 %v5299_v48  ;;  %v5391_v47 = vld [vmem:[#allocation5 + $0x90c] ss:$16 sps:$4 sm:$0xff]   ;;  %v5386_v48 = vld [vmem:[#allocation5 + $0x900] ss:$16 sps:$4 sm:$0xff]  }
 0x141   :  { %3384 = vmatpush1.bf16.msra.mxu0 %v5294_v49  ;;  %3712 = vmatpush1.bf16.msra.mxu1 %v5297_v50  ;;  %v5389_v49 = vld [vmem:[#allocation5 + $0x908] ss:$16 sps:$4 sm:$0xff]   ;;  %v5394_v50 = vld [vmem:[#allocation5 + $0x924] ss:$16 sps:$4 sm:$0xff]  }
 0x142   :  { %3385 = vmatprep.subr.bf16.mxu0 %v5302_v51  ;;  %3713 = vmatprep.subr.bf16.mxu1 %v5305_v52  ;;  %v5397_v51 = vld [vmem:[#allocation5 + $0x92c] ss:$16 sps:$4 sm:$0xff]   ;;  %v5392_v52 = vld [vmem:[#allocation5 + $0x920] ss:$16 sps:$4 sm:$0xff]  }
 0x145   :  { %3386 = vmatpush1.bf16.msra.mxu0 %v5300_v53  ;;  %3714 = vmatpush1.bf16.msra.mxu1 %v5303_v54  ;;  %v5395_v53 = vld [vmem:[#allocation5 + $0x928] ss:$16 sps:$4 sm:$0xff]   ;;  %v5400_v54 = vld [vmem:[#allocation5 + $0x944] ss:$16 sps:$4 sm:$0xff]  }
 0x146   :  { %3387 = vmatprep.subr.bf16.mxu0 %v5308_v55  ;;  %3715 = vmatprep.subr.bf16.mxu1 %v5311_v56  ;;  %v5403_v55 = vld [vmem:[#allocation5 + $0x94c] ss:$16 sps:$4 sm:$0xff]   ;;  %v5398_v56 = vld [vmem:[#allocation5 + $0x940] ss:$16 sps:$4 sm:$0xff]  }
 0x149   :  { %3388 = vmatpush1.bf16.msra.mxu0 %v5306_v57  ;;  %3716 = vmatpush1.bf16.msra.mxu1 %v5309_v58  ;;  %v5401_v57 = vld [vmem:[#allocation5 + $0x948] ss:$16 sps:$4 sm:$0xff]   ;;  %v5406_v58 = vld [vmem:[#allocation5 + $0x964] ss:$16 sps:$4 sm:$0xff]  }
 0x14a   :  { %3389 = vmatprep.subr.bf16.mxu0 %v5314_v59  ;;  %3717 = vmatprep.subr.bf16.mxu1 %v5317_v60  ;;  %v5409_v59 = vld [vmem:[#allocation5 + $0x96c] ss:$16 sps:$4 sm:$0xff]   ;;  %v5404_v60 = vld [vmem:[#allocation5 + $0x960] ss:$16 sps:$4 sm:$0xff]  }
 0x14d   :  { %3390 = vmatpush1.bf16.msra.mxu0 %v5312_v61  ;;  %3718 = vmatpush1.bf16.msra.mxu1 %v5315_v62  ;;  %v5407_v61 = vld [vmem:[#allocation5 + $0x968] ss:$16 sps:$4 sm:$0xff]   ;;  %v5412_v62 = vld [vmem:[#allocation5 + $0x984] ss:$16 sps:$4 sm:$0xff]  }
 0x14e   :  { %3391 = vmatprep.subr.bf16.mxu0 %v5320_v63  ;;  %3719 = vmatprep.subr.bf16.mxu1 %v5323_v0  ;;  %v5415_v63 = vld [vmem:[#allocation5 + $0x98c] ss:$16 sps:$4 sm:$0xff]   ;;  %v5410_v0 = vld [vmem:[#allocation5 + $0x980] ss:$16 sps:$4 sm:$0xff]  }
 0x151   :  { %3392 = vmatpush1.bf16.msra.mxu0 %v5318_v1  ;;  %3720 = vmatpush1.bf16.msra.mxu1 %v5321_v2  ;;  %v5413_v1 = vld [vmem:[#allocation5 + $0x988] ss:$16 sps:$4 sm:$0xff]   ;;  %v5418_v2 = vld [vmem:[#allocation5 + $0x9a4] ss:$16 sps:$4 sm:$0xff]  }
 0x152   :  { %3393 = vmatprep.subr.bf16.mxu0 %v5326_v3  ;;  %3721 = vmatprep.subr.bf16.mxu1 %v5329_v4  ;;  %v5421_v3 = vld [vmem:[#allocation5 + $0x9ac] ss:$16 sps:$4 sm:$0xff]   ;;  %v5416_v4 = vld [vmem:[#allocation5 + $0x9a0] ss:$16 sps:$4 sm:$0xff]  }
 0x155   :  { %3394 = vmatpush1.bf16.msra.mxu0 %v5324_v5  ;;  %3722 = vmatpush1.bf16.msra.mxu1 %v5327_v6  ;;  %v5419_v5 = vld [vmem:[#allocation5 + $0x9a8] ss:$16 sps:$4 sm:$0xff]   ;;  %v5424_v6 = vld [vmem:[#allocation5 + $0x9c4] ss:$16 sps:$4 sm:$0xff]  }
 0x156   :  { %3395 = vmatprep.subr.bf16.mxu0 %v5332_v7  ;;  %3723 = vmatprep.subr.bf16.mxu1 %v5335_v8  ;;  %v5427_v7 = vld [vmem:[#allocation5 + $0x9cc] ss:$16 sps:$4 sm:$0xff]   ;;  %v5422_v8 = vld [vmem:[#allocation5 + $0x9c0] ss:$16 sps:$4 sm:$0xff]  }
 0x159   :  { %3396 = vmatpush1.bf16.msra.mxu0 %v5330_v9  ;;  %3724 = vmatpush1.bf16.msra.mxu1 %v5333_v10  ;;  %v5425_v9 = vld [vmem:[#allocation5 + $0x9c8] ss:$16 sps:$4 sm:$0xff]   ;;  %v5430_v10 = vld [vmem:[#allocation5 + $0x9e4] ss:$16 sps:$4 sm:$0xff]  }
 0x15a   :  { %3406 = vmatprep.subr.bf16.mxu0 %v5340_v12  ;;  %3734 = vmatprep.subr.bf16.mxu1 %v5343_v13  ;;  %v5433_v12 = vld [vmem:[#allocation5 + $0x9ec] ss:$16 sps:$4 sm:$0xff]   ;;  %v5428_v13 = vld [vmem:[#allocation5 + $0x9e0] ss:$16 sps:$4 sm:$0xff]  }
 0x15c   :  { %3398 = vmatmul.mubr.bf16.vlgmr.msra.gmra.mrb[0].mxu0 %v4277_v16  ;;  %3726 = vmatmul.mubr.bf16.vlgmr.msra.gmra.mrb[0].mxu1 %v4277_v16  ;;  %v5438_v16 = vld [vmem:[#allocation5 + $0xa04] ss:$16 sps:$4 sm:$0xff]  }
 0x15d   :  { %3407 = vmatpush1.bf16.msra.mxu0 %v5338_v15  ;;  %3735 = vmatpush1.bf16.msra.mxu1 %v5341_v18  ;;  %v5431_v15 = vld [vmem:[#allocation5 + $0x9e8] ss:$16 sps:$4 sm:$0xff]   ;;  %v5441_v18 = vld [vmem:[#allocation5 + $0xa0c] ss:$16 sps:$4 sm:$0xff]  }
 0x15e   :  { %3408 = vmatprep.subr.bf16.mxu0 %v5346_v19  ;;  %3736 = vmatprep.subr.bf16.mxu1 %v5349_v20  ;;  %v6024_v19 = vld [vmem:[#allocation2 + $0x28] sm:$0xff]  ;;  %v4279_v20 = vcombine.low %v6020_v17, %v6020_v17  ;;  %v5450_v17 = vld [vmem:[#allocation5 + $0xa44] ss:$16 sps:$4 sm:$0xff]  }
 0x15f   :  { %3438 = vmatprep.mubr.bf16.mxu0 %v4280_v11  ;;  %3766 = vmatprep.mubr.bf16.mxu1 %v4280_v11  ;;  %v5436_v11 = vld [vmem:[#allocation5 + $0xa00] ss:$16 sps:$4 sm:$0xff]  }
 0x161   :  { %3409 = vmatpush1.bf16.msra.mxu0 %v5344_v21  ;;  %3737 = vmatpush1.bf16.msra.mxu1 %v5347_v22  ;;  %v5439_v21 = vld [vmem:[#allocation5 + $0xa08] ss:$16 sps:$4 sm:$0xff]   ;;  %v5444_v22 = vld [vmem:[#allocation5 + $0xa24] ss:$16 sps:$4 sm:$0xff]  }
 0x162   :  { %3410 = vmatprep.subr.bf16.mxu0 %v5352_v14  ;;  %3738 = vmatprep.subr.bf16.mxu1 %v5355_v23  ;;  %v5447_v14 = vld [vmem:[#allocation5 + $0xa2c] ss:$16 sps:$4 sm:$0xff]   ;;  %v4282_v23 = vcombine.high %v6024_v19, %v6024_v19 }
 0x165   :  { %3411 = vmatpush1.bf16.msra.mxu0 %v5350_v24  ;;  %3739 = vmatpush1.bf16.msra.mxu1 %v5353_v25  ;;  %v5442_v24 = vld [vmem:[#allocation5 + $0xa20] ss:$16 sps:$4 sm:$0xff]   ;;  %v5445_v25 = vld [vmem:[#allocation5 + $0xa28] ss:$16 sps:$4 sm:$0xff]  }
 0x166   :  { %3412 = vmatprep.subr.bf16.mxu0 %v5358_v26  ;;  %3740 = vmatprep.subr.bf16.mxu1 %v5361_v27  ;;  %v5453_v26 = vld [vmem:[#allocation5 + $0xa4c] ss:$16 sps:$4 sm:$0xff]   ;;  %v5448_v27 = vld [vmem:[#allocation5 + $0xa40] ss:$16 sps:$4 sm:$0xff]  }
 0x169   :  { %3413 = vmatpush1.bf16.msra.mxu0 %v5356_v28  ;;  %3741 = vmatpush1.bf16.msra.mxu1 %v5359_v29  ;;  %v5451_v28 = vld [vmem:[#allocation5 + $0xa48] ss:$16 sps:$4 sm:$0xff]   ;;  %v5456_v29 = vld [vmem:[#allocation5 + $0xa64] ss:$16 sps:$4 sm:$0xff]  }
 0x16a   :  { %3414 = vmatprep.subr.bf16.mxu0 %v5364_v30  ;;  %3742 = vmatprep.subr.bf16.mxu1 %v5367_v31  ;;  %v5459_v30 = vld [vmem:[#allocation5 + $0xa6c] ss:$16 sps:$4 sm:$0xff]   ;;  %v5454_v31 = vld [vmem:[#allocation5 + $0xa60] ss:$16 sps:$4 sm:$0xff]  }
 0x16d   :  { %3415 = vmatpush1.bf16.msra.mxu0 %v5362_v32  ;;  %3743 = vmatpush1.bf16.msra.mxu1 %v5365_v33  ;;  %v5457_v32 = vld [vmem:[#allocation5 + $0xa68] ss:$16 sps:$4 sm:$0xff]   ;;  %v5462_v33 = vld [vmem:[#allocation5 + $0xa84] ss:$16 sps:$4 sm:$0xff]  }
 0x16e   :  { %3416 = vmatprep.subr.bf16.mxu0 %v5370_v34  ;;  %3744 = vmatprep.subr.bf16.mxu1 %v5373_v35  ;;  %v5465_v34 = vld [vmem:[#allocation5 + $0xa8c] ss:$16 sps:$4 sm:$0xff]   ;;  %v5460_v35 = vld [vmem:[#allocation5 + $0xa80] ss:$16 sps:$4 sm:$0xff]  }
 0x171   :  { %3417 = vmatpush1.bf16.msra.mxu0 %v5368_v36  ;;  %3745 = vmatpush1.bf16.msra.mxu1 %v5371_v37  ;;  %v5463_v36 = vld [vmem:[#allocation5 + $0xa88] ss:$16 sps:$4 sm:$0xff]   ;;  %v5468_v37 = vld [vmem:[#allocation5 + $0xaa4] ss:$16 sps:$4 sm:$0xff]  }
 0x172   :  { %3418 = vmatprep.subr.bf16.mxu0 %v5376_v38  ;;  %3746 = vmatprep.subr.bf16.mxu1 %v5379_v39  ;;  %v5471_v38 = vld [vmem:[#allocation5 + $0xaac] ss:$16 sps:$4 sm:$0xff]   ;;  %v5466_v39 = vld [vmem:[#allocation5 + $0xaa0] ss:$16 sps:$4 sm:$0xff]  }
 0x175   :  { %3419 = vmatpush1.bf16.msra.mxu0 %v5374_v40  ;;  %3747 = vmatpush1.bf16.msra.mxu1 %v5377_v41  ;;  %v5469_v40 = vld [vmem:[#allocation5 + $0xaa8] ss:$16 sps:$4 sm:$0xff]   ;;  %v5474_v41 = vld [vmem:[#allocation5 + $0xac4] ss:$16 sps:$4 sm:$0xff]  }
 0x176   :  { %3420 = vmatprep.subr.bf16.mxu0 %v5382_v42  ;;  %3748 = vmatprep.subr.bf16.mxu1 %v5385_v43  ;;  %v5477_v42 = vld [vmem:[#allocation5 + $0xacc] ss:$16 sps:$4 sm:$0xff]   ;;  %v5472_v43 = vld [vmem:[#allocation5 + $0xac0] ss:$16 sps:$4 sm:$0xff]  }
 0x179   :  { %3421 = vmatpush1.bf16.msra.mxu0 %v5380_v44  ;;  %3749 = vmatpush1.bf16.msra.mxu1 %v5383_v45  ;;  %v5475_v44 = vld [vmem:[#allocation5 + $0xac8] ss:$16 sps:$4 sm:$0xff]   ;;  %v5480_v45 = vld [vmem:[#allocation5 + $0xae4] ss:$16 sps:$4 sm:$0xff]  }
 0x17a   :  { %3422 = vmatprep.subr.bf16.mxu0 %v5388_v46  ;;  %3750 = vmatprep.subr.bf16.mxu1 %v5391_v47  ;;  %v5483_v46 = vld [vmem:[#allocation5 + $0xaec] ss:$16 sps:$4 sm:$0xff]   ;;  %v5478_v47 = vld [vmem:[#allocation5 + $0xae0] ss:$16 sps:$4 sm:$0xff]  }
 0x17d   :  { %3423 = vmatpush1.bf16.msra.mxu0 %v5386_v48  ;;  %3751 = vmatpush1.bf16.msra.mxu1 %v5389_v49  ;;  %v5481_v48 = vld [vmem:[#allocation5 + $0xae8] ss:$16 sps:$4 sm:$0xff]   ;;  %v5486_v49 = vld [vmem:[#allocation5 + $0xb04] ss:$16 sps:$4 sm:$0xff]  }
 0x17e   :  { %3424 = vmatprep.subr.bf16.mxu0 %v5394_v50  ;;  %3752 = vmatprep.subr.bf16.mxu1 %v5397_v51  ;;  %v5489_v50 = vld [vmem:[#allocation5 + $0xb0c] ss:$16 sps:$4 sm:$0xff]   ;;  %v5484_v51 = vld [vmem:[#allocation5 + $0xb00] ss:$16 sps:$4 sm:$0xff]  }
 0x181   :  { %3425 = vmatpush1.bf16.msra.mxu0 %v5392_v52  ;;  %3753 = vmatpush1.bf16.msra.mxu1 %v5395_v53  ;;  %v5487_v52 = vld [vmem:[#allocation5 + $0xb08] ss:$16 sps:$4 sm:$0xff]   ;;  %v5492_v53 = vld [vmem:[#allocation5 + $0xb24] ss:$16 sps:$4 sm:$0xff]  }
 0x182   :  { %3426 = vmatprep.subr.bf16.mxu0 %v5400_v54  ;;  %3754 = vmatprep.subr.bf16.mxu1 %v5403_v55  ;;  %v5495_v54 = vld [vmem:[#allocation5 + $0xb2c] ss:$16 sps:$4 sm:$0xff]   ;;  %v5490_v55 = vld [vmem:[#allocation5 + $0xb20] ss:$16 sps:$4 sm:$0xff]  }
 0x185   :  { %3427 = vmatpush1.bf16.msra.mxu0 %v5398_v56  ;;  %3755 = vmatpush1.bf16.msra.mxu1 %v5401_v57  ;;  %v5493_v56 = vld [vmem:[#allocation5 + $0xb28] ss:$16 sps:$4 sm:$0xff]   ;;  %v5498_v57 = vld [vmem:[#allocation5 + $0xb44] ss:$16 sps:$4 sm:$0xff]  }
 0x186   :  { %3428 = vmatprep.subr.bf16.mxu0 %v5406_v58  ;;  %3756 = vmatprep.subr.bf16.mxu1 %v5409_v59  ;;  %v5501_v58 = vld [vmem:[#allocation5 + $0xb4c] ss:$16 sps:$4 sm:$0xff]   ;;  %v5496_v59 = vld [vmem:[#allocation5 + $0xb40] ss:$16 sps:$4 sm:$0xff]  }
 0x189   :  { %3429 = vmatpush1.bf16.msra.mxu0 %v5404_v60  ;;  %3757 = vmatpush1.bf16.msra.mxu1 %v5407_v61  ;;  %v5499_v60 = vld [vmem:[#allocation5 + $0xb48] ss:$16 sps:$4 sm:$0xff]   ;;  %v5504_v61 = vld [vmem:[#allocation5 + $0xb64] ss:$16 sps:$4 sm:$0xff]  }
 0x18a   :  { %3430 = vmatprep.subr.bf16.mxu0 %v5412_v62  ;;  %3758 = vmatprep.subr.bf16.mxu1 %v5415_v63  ;;  %v5507_v62 = vld [vmem:[#allocation5 + $0xb6c] ss:$16 sps:$4 sm:$0xff]   ;;  %v5502_v63 = vld [vmem:[#allocation5 + $0xb60] ss:$16 sps:$4 sm:$0xff]  }
 0x18d   :  { %3431 = vmatpush1.bf16.msra.mxu0 %v5410_v0  ;;  %3759 = vmatpush1.bf16.msra.mxu1 %v5413_v1  ;;  %v5505_v0 = vld [vmem:[#allocation5 + $0xb68] ss:$16 sps:$4 sm:$0xff]   ;;  %v5510_v1 = vld [vmem:[#allocation5 + $0xb84] ss:$16 sps:$4 sm:$0xff]  }
 0x18e   :  { %3432 = vmatprep.subr.bf16.mxu0 %v5418_v2  ;;  %3760 = vmatprep.subr.bf16.mxu1 %v5421_v3  ;;  %v5513_v2 = vld [vmem:[#allocation5 + $0xb8c] ss:$16 sps:$4 sm:$0xff]   ;;  %v5508_v3 = vld [vmem:[#allocation5 + $0xb80] ss:$16 sps:$4 sm:$0xff]  }
 0x191   :  { %3433 = vmatpush1.bf16.msra.mxu0 %v5416_v4  ;;  %3761 = vmatpush1.bf16.msra.mxu1 %v5419_v5  ;;  %v5511_v4 = vld [vmem:[#allocation5 + $0xb88] ss:$16 sps:$4 sm:$0xff]   ;;  %v5516_v5 = vld [vmem:[#allocation5 + $0xba4] ss:$16 sps:$4 sm:$0xff]  }
 0x192   :  { %3434 = vmatprep.subr.bf16.mxu0 %v5424_v6  ;;  %3762 = vmatprep.subr.bf16.mxu1 %v5427_v7  ;;  %v5519_v6 = vld [vmem:[#allocation5 + $0xbac] ss:$16 sps:$4 sm:$0xff]   ;;  %v5514_v7 = vld [vmem:[#allocation5 + $0xba0] ss:$16 sps:$4 sm:$0xff]  }
 0x195   :  { %3435 = vmatpush1.bf16.msra.mxu0 %v5422_v8  ;;  %3763 = vmatpush1.bf16.msra.mxu1 %v5425_v9  ;;  %v5517_v8 = vld [vmem:[#allocation5 + $0xba8] ss:$16 sps:$4 sm:$0xff]   ;;  %v5522_v9 = vld [vmem:[#allocation5 + $0xbc4] ss:$16 sps:$4 sm:$0xff]  }
 0x196   :  { %3436 = vmatprep.subr.bf16.mxu0 %v5430_v10  ;;  %3764 = vmatprep.subr.bf16.mxu1 %v5433_v12  ;;  %v5525_v10 = vld [vmem:[#allocation5 + $0xbcc] ss:$16 sps:$4 sm:$0xff]   ;;  %v5520_v12 = vld [vmem:[#allocation5 + $0xbc0] ss:$16 sps:$4 sm:$0xff]  }
 0x199   :  { %3437 = vmatpush1.bf16.msra.mxu0 %v5428_v13  ;;  %3765 = vmatpush1.bf16.msra.mxu1 %v5431_v15  ;;  %v5523_v13 = vld [vmem:[#allocation5 + $0xbc8] ss:$16 sps:$4 sm:$0xff]   ;;  %v5528_v15 = vld [vmem:[#allocation5 + $0xbe4] ss:$16 sps:$4 sm:$0xff]  }
 0x19a   :  { %3447 = vmatprep.subr.bf16.mxu0 %v5438_v16  ;;  %3775 = vmatprep.subr.bf16.mxu1 %v5441_v18  ;;  %v5531_v16 = vld [vmem:[#allocation5 + $0xbec] ss:$16 sps:$4 sm:$0xff]   ;;  %v5526_v18 = vld [vmem:[#allocation5 + $0xbe0] ss:$16 sps:$4 sm:$0xff]  }
 0x19c   :  { %3439 = vmatmul.mubr.bf16.vlgmr.msra.gmra.mrb[0].mxu0 %v4279_v20  ;;  %3767 = vmatmul.mubr.bf16.vlgmr.msra.gmra.mrb[0].mxu1 %v4279_v20  ;;  %v5529_v20 = vld [vmem:[#allocation5 + $0xbe8] ss:$16 sps:$4 sm:$0xff]  }
 0x19d   :  { %3448 = vmatpush1.bf16.msra.mxu0 %v5436_v11  ;;  %3776 = vmatpush1.bf16.msra.mxu1 %v5439_v21  ;;  %v5536_v11 = vld [vmem:[#allocation5 + $0xc04] ss:$16 sps:$4 sm:$0xff]   ;;  %v5539_v21 = vld [vmem:[#allocation5 + $0xc0c] ss:$16 sps:$4 sm:$0xff]  }
 0x19e   :  { %3449 = vmatprep.subr.bf16.mxu0 %v5444_v22  ;;  %3777 = vmatprep.subr.bf16.mxu1 %v5447_v14  ;;  %v4281_v22 = vcombine.low %v6024_v19, %v6024_v19  ;;  %v6032_v14 = vld [vmem:[#allocation2 + $0x30] sm:$0xff] }
 0x19f   :  { %3479 = vmatprep.mubr.bf16.mxu0 %v4282_v23  ;;  %3807 = vmatprep.mubr.bf16.mxu1 %v4282_v23  ;;  %v5534_v23 = vld [vmem:[#allocation5 + $0xc00] ss:$16 sps:$4 sm:$0xff]   ;;  %v5548_v19 = vld [vmem:[#allocation5 + $0xc44] ss:$16 sps:$4 sm:$0xff]  }
 0x1a1   :  { %3450 = vmatpush1.bf16.msra.mxu0 %v5442_v24  ;;  %3778 = vmatpush1.bf16.msra.mxu1 %v5445_v25  ;;  %v5537_v24 = vld [vmem:[#allocation5 + $0xc08] ss:$16 sps:$4 sm:$0xff]   ;;  %v5542_v25 = vld [vmem:[#allocation5 + $0xc24] ss:$16 sps:$4 sm:$0xff]  }
 0x1a2   :  { %3451 = vmatprep.subr.bf16.mxu0 %v5450_v17  ;;  %3779 = vmatprep.subr.bf16.mxu1 %v5453_v26  ;;  %v5545_v17 = vld [vmem:[#allocation5 + $0xc2c] ss:$16 sps:$4 sm:$0xff]   ;;  %v4284_v26 = vcombine.high %v6032_v14, %v6032_v14 }
 0x1a5   :  { %3452 = vmatpush1.bf16.msra.mxu0 %v5448_v27  ;;  %3780 = vmatpush1.bf16.msra.mxu1 %v5451_v28  ;;  %v5540_v27 = vld [vmem:[#allocation5 + $0xc20] ss:$16 sps:$4 sm:$0xff]   ;;  %v5543_v28 = vld [vmem:[#allocation5 + $0xc28] ss:$16 sps:$4 sm:$0xff]  }
 0x1a6   :  { %3453 = vmatprep.subr.bf16.mxu0 %v5456_v29  ;;  %3781 = vmatprep.subr.bf16.mxu1 %v5459_v30  ;;  %v5551_v29 = vld [vmem:[#allocation5 + $0xc4c] ss:$16 sps:$4 sm:$0xff]   ;;  %v5546_v30 = vld [vmem:[#allocation5 + $0xc40] ss:$16 sps:$4 sm:$0xff]  }
 0x1a9   :  { %3454 = vmatpush1.bf16.msra.mxu0 %v5454_v31  ;;  %3782 = vmatpush1.bf16.msra.mxu1 %v5457_v32  ;;  %v5549_v31 = vld [vmem:[#allocation5 + $0xc48] ss:$16 sps:$4 sm:$0xff]   ;;  %v5554_v32 = vld [vmem:[#allocation5 + $0xc64] ss:$16 sps:$4 sm:$0xff]  }
 0x1aa   :  { %3455 = vmatprep.subr.bf16.mxu0 %v5462_v33  ;;  %3783 = vmatprep.subr.bf16.mxu1 %v5465_v34  ;;  %v5557_v33 = vld [vmem:[#allocation5 + $0xc6c] ss:$16 sps:$4 sm:$0xff]   ;;  %v5552_v34 = vld [vmem:[#allocation5 + $0xc60] ss:$16 sps:$4 sm:$0xff]  }
 0x1ad   :  { %3456 = vmatpush1.bf16.msra.mxu0 %v5460_v35  ;;  %3784 = vmatpush1.bf16.msra.mxu1 %v5463_v36  ;;  %v5555_v35 = vld [vmem:[#allocation5 + $0xc68] ss:$16 sps:$4 sm:$0xff]   ;;  %v5560_v36 = vld [vmem:[#allocation5 + $0xc84] ss:$16 sps:$4 sm:$0xff]  }
 0x1ae   :  { %3457 = vmatprep.subr.bf16.mxu0 %v5468_v37  ;;  %3785 = vmatprep.subr.bf16.mxu1 %v5471_v38  ;;  %v5563_v37 = vld [vmem:[#allocation5 + $0xc8c] ss:$16 sps:$4 sm:$0xff]   ;;  %v5558_v38 = vld [vmem:[#allocation5 + $0xc80] ss:$16 sps:$4 sm:$0xff]  }
 0x1b1   :  { %3458 = vmatpush1.bf16.msra.mxu0 %v5466_v39  ;;  %3786 = vmatpush1.bf16.msra.mxu1 %v5469_v40  ;;  %v5561_v39 = vld [vmem:[#allocation5 + $0xc88] ss:$16 sps:$4 sm:$0xff]   ;;  %v5566_v40 = vld [vmem:[#allocation5 + $0xca4] ss:$16 sps:$4 sm:$0xff]  }
 0x1b2   :  { %3459 = vmatprep.subr.bf16.mxu0 %v5474_v41  ;;  %3787 = vmatprep.subr.bf16.mxu1 %v5477_v42  ;;  %v5569_v41 = vld [vmem:[#allocation5 + $0xcac] ss:$16 sps:$4 sm:$0xff]   ;;  %v5564_v42 = vld [vmem:[#allocation5 + $0xca0] ss:$16 sps:$4 sm:$0xff]  }
 0x1b5   :  { %3460 = vmatpush1.bf16.msra.mxu0 %v5472_v43  ;;  %3788 = vmatpush1.bf16.msra.mxu1 %v5475_v44  ;;  %v5567_v43 = vld [vmem:[#allocation5 + $0xca8] ss:$16 sps:$4 sm:$0xff]   ;;  %v5572_v44 = vld [vmem:[#allocation5 + $0xcc4] ss:$16 sps:$4 sm:$0xff]  }
 0x1b6   :  { %3461 = vmatprep.subr.bf16.mxu0 %v5480_v45  ;;  %3789 = vmatprep.subr.bf16.mxu1 %v5483_v46  ;;  %v5575_v45 = vld [vmem:[#allocation5 + $0xccc] ss:$16 sps:$4 sm:$0xff]   ;;  %v5570_v46 = vld [vmem:[#allocation5 + $0xcc0] ss:$16 sps:$4 sm:$0xff]  }
 0x1b9   :  { %3462 = vmatpush1.bf16.msra.mxu0 %v5478_v47  ;;  %3790 = vmatpush1.bf16.msra.mxu1 %v5481_v48  ;;  %v5573_v47 = vld [vmem:[#allocation5 + $0xcc8] ss:$16 sps:$4 sm:$0xff]   ;;  %v5578_v48 = vld [vmem:[#allocation5 + $0xce4] ss:$16 sps:$4 sm:$0xff]  }
 0x1ba   :  { %3463 = vmatprep.subr.bf16.mxu0 %v5486_v49  ;;  %3791 = vmatprep.subr.bf16.mxu1 %v5489_v50  ;;  %v5581_v49 = vld [vmem:[#allocation5 + $0xcec] ss:$16 sps:$4 sm:$0xff]   ;;  %v5576_v50 = vld [vmem:[#allocation5 + $0xce0] ss:$16 sps:$4 sm:$0xff]  }
 0x1bd   :  { %3464 = vmatpush1.bf16.msra.mxu0 %v5484_v51  ;;  %3792 = vmatpush1.bf16.msra.mxu1 %v5487_v52  ;;  %v5579_v51 = vld [vmem:[#allocation5 + $0xce8] ss:$16 sps:$4 sm:$0xff]   ;;  %v5584_v52 = vld [vmem:[#allocation5 + $0xd04] ss:$16 sps:$4 sm:$0xff]  }
 0x1be   :  { %3465 = vmatprep.subr.bf16.mxu0 %v5492_v53  ;;  %3793 = vmatprep.subr.bf16.mxu1 %v5495_v54  ;;  %v5587_v53 = vld [vmem:[#allocation5 + $0xd0c] ss:$16 sps:$4 sm:$0xff]   ;;  %v5582_v54 = vld [vmem:[#allocation5 + $0xd00] ss:$16 sps:$4 sm:$0xff]  }
 0x1c1   :  { %3466 = vmatpush1.bf16.msra.mxu0 %v5490_v55  ;;  %3794 = vmatpush1.bf16.msra.mxu1 %v5493_v56  ;;  %v5585_v55 = vld [vmem:[#allocation5 + $0xd08] ss:$16 sps:$4 sm:$0xff]   ;;  %v5590_v56 = vld [vmem:[#allocation5 + $0xd24] ss:$16 sps:$4 sm:$0xff]  }
 0x1c2   :  { %3467 = vmatprep.subr.bf16.mxu0 %v5498_v57  ;;  %3795 = vmatprep.subr.bf16.mxu1 %v5501_v58  ;;  %v5593_v57 = vld [vmem:[#allocation5 + $0xd2c] ss:$16 sps:$4 sm:$0xff]   ;;  %v5588_v58 = vld [vmem:[#allocation5 + $0xd20] ss:$16 sps:$4 sm:$0xff]  }
 0x1c5   :  { %3468 = vmatpush1.bf16.msra.mxu0 %v5496_v59  ;;  %3796 = vmatpush1.bf16.msra.mxu1 %v5499_v60  ;;  %v5591_v59 = vld [vmem:[#allocation5 + $0xd28] ss:$16 sps:$4 sm:$0xff]   ;;  %v5596_v60 = vld [vmem:[#allocation5 + $0xd44] ss:$16 sps:$4 sm:$0xff]  }
 0x1c6   :  { %3469 = vmatprep.subr.bf16.mxu0 %v5504_v61  ;;  %3797 = vmatprep.subr.bf16.mxu1 %v5507_v62  ;;  %v5599_v61 = vld [vmem:[#allocation5 + $0xd4c] ss:$16 sps:$4 sm:$0xff]   ;;  %v5594_v62 = vld [vmem:[#allocation5 + $0xd40] ss:$16 sps:$4 sm:$0xff]  }
 0x1c9   :  { %3470 = vmatpush1.bf16.msra.mxu0 %v5502_v63  ;;  %3798 = vmatpush1.bf16.msra.mxu1 %v5505_v0  ;;  %v5597_v63 = vld [vmem:[#allocation5 + $0xd48] ss:$16 sps:$4 sm:$0xff]   ;;  %v5602_v0 = vld [vmem:[#allocation5 + $0xd64] ss:$16 sps:$4 sm:$0xff]  }
 0x1ca   :  { %3471 = vmatprep.subr.bf16.mxu0 %v5510_v1  ;;  %3799 = vmatprep.subr.bf16.mxu1 %v5513_v2  ;;  %v5605_v1 = vld [vmem:[#allocation5 + $0xd6c] ss:$16 sps:$4 sm:$0xff]   ;;  %v5600_v2 = vld [vmem:[#allocation5 + $0xd60] ss:$16 sps:$4 sm:$0xff]  }
 0x1cd   :  { %3472 = vmatpush1.bf16.msra.mxu0 %v5508_v3  ;;  %3800 = vmatpush1.bf16.msra.mxu1 %v5511_v4  ;;  %v5603_v3 = vld [vmem:[#allocation5 + $0xd68] ss:$16 sps:$4 sm:$0xff]   ;;  %v5608_v4 = vld [vmem:[#allocation5 + $0xd84] ss:$16 sps:$4 sm:$0xff]  }
 0x1ce   :  { %3473 = vmatprep.subr.bf16.mxu0 %v5516_v5  ;;  %3801 = vmatprep.subr.bf16.mxu1 %v5519_v6  ;;  %v5611_v5 = vld [vmem:[#allocation5 + $0xd8c] ss:$16 sps:$4 sm:$0xff]   ;;  %v5606_v6 = vld [vmem:[#allocation5 + $0xd80] ss:$16 sps:$4 sm:$0xff]  }
 0x1d1   :  { %3474 = vmatpush1.bf16.msra.mxu0 %v5514_v7  ;;  %3802 = vmatpush1.bf16.msra.mxu1 %v5517_v8  ;;  %v5609_v7 = vld [vmem:[#allocation5 + $0xd88] ss:$16 sps:$4 sm:$0xff]   ;;  %v5614_v8 = vld [vmem:[#allocation5 + $0xda4] ss:$16 sps:$4 sm:$0xff]  }
 0x1d2   :  { %3475 = vmatprep.subr.bf16.mxu0 %v5522_v9  ;;  %3803 = vmatprep.subr.bf16.mxu1 %v5525_v10  ;;  %v5617_v9 = vld [vmem:[#allocation5 + $0xdac] ss:$16 sps:$4 sm:$0xff]   ;;  %v5612_v10 = vld [vmem:[#allocation5 + $0xda0] ss:$16 sps:$4 sm:$0xff]  }
 0x1d5   :  { %3476 = vmatpush1.bf16.msra.mxu0 %v5520_v12  ;;  %3804 = vmatpush1.bf16.msra.mxu1 %v5523_v13  ;;  %v5615_v12 = vld [vmem:[#allocation5 + $0xda8] ss:$16 sps:$4 sm:$0xff]   ;;  %v5620_v13 = vld [vmem:[#allocation5 + $0xdc4] ss:$16 sps:$4 sm:$0xff]  }
 0x1d6   :  { %3477 = vmatprep.subr.bf16.mxu0 %v5528_v15  ;;  %3805 = vmatprep.subr.bf16.mxu1 %v5531_v16  ;;  %v5623_v15 = vld [vmem:[#allocation5 + $0xdcc] ss:$16 sps:$4 sm:$0xff]   ;;  %v5618_v16 = vld [vmem:[#allocation5 + $0xdc0] ss:$16 sps:$4 sm:$0xff]  }
 0x1d9   :  { %3478 = vmatpush1.bf16.msra.mxu0 %v5526_v18  ;;  %3806 = vmatpush1.bf16.msra.mxu1 %v5529_v20  ;;  %v5621_v18 = vld [vmem:[#allocation5 + $0xdc8] ss:$16 sps:$4 sm:$0xff]   ;;  %v5626_v20 = vld [vmem:[#allocation5 + $0xde4] ss:$16 sps:$4 sm:$0xff]  }
 0x1da   :  { %3488 = vmatprep.subr.bf16.mxu0 %v5536_v11  ;;  %3816 = vmatprep.subr.bf16.mxu1 %v5539_v21  ;;  %v5629_v11 = vld [vmem:[#allocation5 + $0xdec] ss:$16 sps:$4 sm:$0xff]   ;;  %v5624_v21 = vld [vmem:[#allocation5 + $0xde0] ss:$16 sps:$4 sm:$0xff]  }
 0x1dc   :  { %3480 = vmatmul.mubr.bf16.vlgmr.msra.gmra.mrb[0].mxu0 %v4281_v22  ;;  %3808 = vmatmul.mubr.bf16.vlgmr.msra.gmra.mrb[0].mxu1 %v4281_v22  ;;  %v5627_v22 = vld [vmem:[#allocation5 + $0xde8] ss:$16 sps:$4 sm:$0xff]  }
 0x1dd   :  { %3489 = vmatpush1.bf16.msra.mxu0 %v5534_v23  ;;  %3817 = vmatpush1.bf16.msra.mxu1 %v5537_v24  ;;  %v5634_v23 = vld [vmem:[#allocation5 + $0xe04] ss:$16 sps:$4 sm:$0xff]   ;;  %v5637_v24 = vld [vmem:[#allocation5 + $0xe0c] ss:$16 sps:$4 sm:$0xff]  }
 0x1de   :  { %3490 = vmatprep.subr.bf16.mxu0 %v5542_v25  ;;  %3818 = vmatprep.subr.bf16.mxu1 %v5545_v17  ;;  %v4283_v25 = vcombine.low %v6032_v14, %v6032_v14  ;;  %v6038_v17 = vld [vmem:[#allocation2 + $0x38] sm:$0xff]  ;;  %v5646_v14 = vld [vmem:[#allocation5 + $0xe44] ss:$16 sps:$4 sm:$0xff]  }
 0x1df   :  { %3520 = vmatprep.mubr.bf16.mxu0 %v4284_v26  ;;  %3848 = vmatprep.mubr.bf16.mxu1 %v4284_v26  ;;  %v5632_v26 = vld [vmem:[#allocation5 + $0xe00] ss:$16 sps:$4 sm:$0xff]  }
 0x1e1   :  { %3491 = vmatpush1.bf16.msra.mxu0 %v5540_v27  ;;  %3819 = vmatpush1.bf16.msra.mxu1 %v5543_v28  ;;  %v5635_v27 = vld [vmem:[#allocation5 + $0xe08] ss:$16 sps:$4 sm:$0xff]   ;;  %v5640_v28 = vld [vmem:[#allocation5 + $0xe24] ss:$16 sps:$4 sm:$0xff]  }
 0x1e2   :  { %3492 = vmatprep.subr.bf16.mxu0 %v5548_v19  ;;  %3820 = vmatprep.subr.bf16.mxu1 %v5551_v29  ;;  %v5643_v19 = vld [vmem:[#allocation5 + $0xe2c] ss:$16 sps:$4 sm:$0xff]   ;;  %v4286_v29 = vcombine.high %v6038_v17, %v6038_v17 }
 0x1e5   :  { %3493 = vmatpush1.bf16.msra.mxu0 %v5546_v30  ;;  %3821 = vmatpush1.bf16.msra.mxu1 %v5549_v31  ;;  %v5638_v30 = vld [vmem:[#allocation5 + $0xe20] ss:$16 sps:$4 sm:$0xff]   ;;  %v5641_v31 = vld [vmem:[#allocation5 + $0xe28] ss:$16 sps:$4 sm:$0xff]  }
 0x1e6   :  { %3494 = vmatprep.subr.bf16.mxu0 %v5554_v32  ;;  %3822 = vmatprep.subr.bf16.mxu1 %v5557_v33  ;;  %v5649_v32 = vld [vmem:[#allocation5 + $0xe4c] ss:$16 sps:$4 sm:$0xff]   ;;  %v5644_v33 = vld [vmem:[#allocation5 + $0xe40] ss:$16 sps:$4 sm:$0xff]  }
 0x1e9   :  { %3495 = vmatpush1.bf16.msra.mxu0 %v5552_v34  ;;  %3823 = vmatpush1.bf16.msra.mxu1 %v5555_v35  ;;  %v5647_v34 = vld [vmem:[#allocation5 + $0xe48] ss:$16 sps:$4 sm:$0xff]   ;;  %v5652_v35 = vld [vmem:[#allocation5 + $0xe64] ss:$16 sps:$4 sm:$0xff]  }
 0x1ea   :  { %3496 = vmatprep.subr.bf16.mxu0 %v5560_v36  ;;  %3824 = vmatprep.subr.bf16.mxu1 %v5563_v37  ;;  %v5655_v36 = vld [vmem:[#allocation5 + $0xe6c] ss:$16 sps:$4 sm:$0xff]   ;;  %v5650_v37 = vld [vmem:[#allocation5 + $0xe60] ss:$16 sps:$4 sm:$0xff]  }
 0x1ed   :  { %3497 = vmatpush1.bf16.msra.mxu0 %v5558_v38  ;;  %3825 = vmatpush1.bf16.msra.mxu1 %v5561_v39  ;;  %v5653_v38 = vld [vmem:[#allocation5 + $0xe68] ss:$16 sps:$4 sm:$0xff]   ;;  %v5658_v39 = vld [vmem:[#allocation5 + $0xe84] ss:$16 sps:$4 sm:$0xff]  }
 0x1ee   :  { %3498 = vmatprep.subr.bf16.mxu0 %v5566_v40  ;;  %3826 = vmatprep.subr.bf16.mxu1 %v5569_v41  ;;  %v5661_v40 = vld [vmem:[#allocation5 + $0xe8c] ss:$16 sps:$4 sm:$0xff]   ;;  %v5656_v41 = vld [vmem:[#allocation5 + $0xe80] ss:$16 sps:$4 sm:$0xff]  }
 0x1f1   :  { %3499 = vmatpush1.bf16.msra.mxu0 %v5564_v42  ;;  %3827 = vmatpush1.bf16.msra.mxu1 %v5567_v43  ;;  %v5659_v42 = vld [vmem:[#allocation5 + $0xe88] ss:$16 sps:$4 sm:$0xff]   ;;  %v5664_v43 = vld [vmem:[#allocation5 + $0xea4] ss:$16 sps:$4 sm:$0xff]  }
 0x1f2   :  { %3500 = vmatprep.subr.bf16.mxu0 %v5572_v44  ;;  %3828 = vmatprep.subr.bf16.mxu1 %v5575_v45  ;;  %v5667_v44 = vld [vmem:[#allocation5 + $0xeac] ss:$16 sps:$4 sm:$0xff]   ;;  %v5662_v45 = vld [vmem:[#allocation5 + $0xea0] ss:$16 sps:$4 sm:$0xff]  }
 0x1f5   :  { %3501 = vmatpush1.bf16.msra.mxu0 %v5570_v46  ;;  %3829 = vmatpush1.bf16.msra.mxu1 %v5573_v47  ;;  %v5665_v46 = vld [vmem:[#allocation5 + $0xea8] ss:$16 sps:$4 sm:$0xff]   ;;  %v5670_v47 = vld [vmem:[#allocation5 + $0xec4] ss:$16 sps:$4 sm:$0xff]  }
 0x1f6   :  { %3502 = vmatprep.subr.bf16.mxu0 %v5578_v48  ;;  %3830 = vmatprep.subr.bf16.mxu1 %v5581_v49  ;;  %v5673_v48 = vld [vmem:[#allocation5 + $0xecc] ss:$16 sps:$4 sm:$0xff]   ;;  %v5668_v49 = vld [vmem:[#allocation5 + $0xec0] ss:$16 sps:$4 sm:$0xff]  }
 0x1f9   :  { %3503 = vmatpush1.bf16.msra.mxu0 %v5576_v50  ;;  %3831 = vmatpush1.bf16.msra.mxu1 %v5579_v51  ;;  %v5671_v50 = vld [vmem:[#allocation5 + $0xec8] ss:$16 sps:$4 sm:$0xff]   ;;  %v5676_v51 = vld [vmem:[#allocation5 + $0xee4] ss:$16 sps:$4 sm:$0xff]  }
 0x1fa   :  { %3504 = vmatprep.subr.bf16.mxu0 %v5584_v52  ;;  %3832 = vmatprep.subr.bf16.mxu1 %v5587_v53  ;;  %v5679_v52 = vld [vmem:[#allocation5 + $0xeec] ss:$16 sps:$4 sm:$0xff]   ;;  %v5674_v53 = vld [vmem:[#allocation5 + $0xee0] ss:$16 sps:$4 sm:$0xff]  }
 0x1fd   :  { %3505 = vmatpush1.bf16.msra.mxu0 %v5582_v54  ;;  %3833 = vmatpush1.bf16.msra.mxu1 %v5585_v55  ;;  %v5677_v54 = vld [vmem:[#allocation5 + $0xee8] ss:$16 sps:$4 sm:$0xff]   ;;  %v5682_v55 = vld [vmem:[#allocation5 + $0xf04] ss:$16 sps:$4 sm:$0xff]  }
 0x1fe   :  { %3506 = vmatprep.subr.bf16.mxu0 %v5590_v56  ;;  %3834 = vmatprep.subr.bf16.mxu1 %v5593_v57  ;;  %v5685_v56 = vld [vmem:[#allocation5 + $0xf0c] ss:$16 sps:$4 sm:$0xff]   ;;  %v5680_v57 = vld [vmem:[#allocation5 + $0xf00] ss:$16 sps:$4 sm:$0xff]  }
 0x201   :  { %3507 = vmatpush1.bf16.msra.mxu0 %v5588_v58  ;;  %3835 = vmatpush1.bf16.msra.mxu1 %v5591_v59  ;;  %v5683_v58 = vld [vmem:[#allocation5 + $0xf08] ss:$16 sps:$4 sm:$0xff]   ;;  %v5688_v59 = vld [vmem:[#allocation5 + $0xf24] ss:$16 sps:$4 sm:$0xff]  }
 0x202   :  { %3508 = vmatprep.subr.bf16.mxu0 %v5596_v60  ;;  %3836 = vmatprep.subr.bf16.mxu1 %v5599_v61  ;;  %v5691_v60 = vld [vmem:[#allocation5 + $0xf2c] ss:$16 sps:$4 sm:$0xff]   ;;  %v5686_v61 = vld [vmem:[#allocation5 + $0xf20] ss:$16 sps:$4 sm:$0xff]  }
 0x205   :  { %3509 = vmatpush1.bf16.msra.mxu0 %v5594_v62  ;;  %3837 = vmatpush1.bf16.msra.mxu1 %v5597_v63  ;;  %v5689_v62 = vld [vmem:[#allocation5 + $0xf28] ss:$16 sps:$4 sm:$0xff]   ;;  %v5694_v63 = vld [vmem:[#allocation5 + $0xf44] ss:$16 sps:$4 sm:$0xff]  }
 0x206   :  { %3510 = vmatprep.subr.bf16.mxu0 %v5602_v0  ;;  %3838 = vmatprep.subr.bf16.mxu1 %v5605_v1  ;;  %v5697_v0 = vld [vmem:[#allocation5 + $0xf4c] ss:$16 sps:$4 sm:$0xff]   ;;  %v5692_v1 = vld [vmem:[#allocation5 + $0xf40] ss:$16 sps:$4 sm:$0xff]  }
 0x209   :  { %3511 = vmatpush1.bf16.msra.mxu0 %v5600_v2  ;;  %3839 = vmatpush1.bf16.msra.mxu1 %v5603_v3  ;;  %v5695_v2 = vld [vmem:[#allocation5 + $0xf48] ss:$16 sps:$4 sm:$0xff]   ;;  %v5700_v3 = vld [vmem:[#allocation5 + $0xf64] ss:$16 sps:$4 sm:$0xff]  }
 0x20a   :  { %3512 = vmatprep.subr.bf16.mxu0 %v5608_v4  ;;  %3840 = vmatprep.subr.bf16.mxu1 %v5611_v5  ;;  %v5703_v4 = vld [vmem:[#allocation5 + $0xf6c] ss:$16 sps:$4 sm:$0xff]   ;;  %v5698_v5 = vld [vmem:[#allocation5 + $0xf60] ss:$16 sps:$4 sm:$0xff]  }
 0x20d   :  { %3513 = vmatpush1.bf16.msra.mxu0 %v5606_v6  ;;  %3841 = vmatpush1.bf16.msra.mxu1 %v5609_v7  ;;  %v5701_v6 = vld [vmem:[#allocation5 + $0xf68] ss:$16 sps:$4 sm:$0xff]   ;;  %v5706_v7 = vld [vmem:[#allocation5 + $0xf84] ss:$16 sps:$4 sm:$0xff]  }
 0x20e   :  { %3514 = vmatprep.subr.bf16.mxu0 %v5614_v8  ;;  %3842 = vmatprep.subr.bf16.mxu1 %v5617_v9  ;;  %v5709_v8 = vld [vmem:[#allocation5 + $0xf8c] ss:$16 sps:$4 sm:$0xff]   ;;  %v5704_v9 = vld [vmem:[#allocation5 + $0xf80] ss:$16 sps:$4 sm:$0xff]  }
 0x211   :  { %3515 = vmatpush1.bf16.msra.mxu0 %v5612_v10  ;;  %3843 = vmatpush1.bf16.msra.mxu1 %v5615_v12  ;;  %v5707_v10 = vld [vmem:[#allocation5 + $0xf88] ss:$16 sps:$4 sm:$0xff]   ;;  %v5712_v12 = vld [vmem:[#allocation5 + $0xfa4] ss:$16 sps:$4 sm:$0xff]  }
 0x212   :  { %3516 = vmatprep.subr.bf16.mxu0 %v5620_v13  ;;  %3844 = vmatprep.subr.bf16.mxu1 %v5623_v15  ;;  %v5715_v13 = vld [vmem:[#allocation5 + $0xfac] ss:$16 sps:$4 sm:$0xff]   ;;  %v5710_v15 = vld [vmem:[#allocation5 + $0xfa0] ss:$16 sps:$4 sm:$0xff]  }
 0x215   :  { %3517 = vmatpush1.bf16.msra.mxu0 %v5618_v16  ;;  %3845 = vmatpush1.bf16.msra.mxu1 %v5621_v18  ;;  %v5713_v16 = vld [vmem:[#allocation5 + $0xfa8] ss:$16 sps:$4 sm:$0xff]   ;;  %v5718_v18 = vld [vmem:[#allocation5 + $0xfc4] ss:$16 sps:$4 sm:$0xff]  }
 0x216   :  { %3518 = vmatprep.subr.bf16.mxu0 %v5626_v20  ;;  %3846 = vmatprep.subr.bf16.mxu1 %v5629_v11  ;;  %v5721_v20 = vld [vmem:[#allocation5 + $0xfcc] ss:$16 sps:$4 sm:$0xff]   ;;  %v5716_v11 = vld [vmem:[#allocation5 + $0xfc0] ss:$16 sps:$4 sm:$0xff]  }
 0x219   :  { %3519 = vmatpush1.bf16.msra.mxu0 %v5624_v21  ;;  %3847 = vmatpush1.bf16.msra.mxu1 %v5627_v22  ;;  %v5719_v21 = vld [vmem:[#allocation5 + $0xfc8] ss:$16 sps:$4 sm:$0xff]   ;;  %v5724_v22 = vld [vmem:[#allocation5 + $0xfe4] ss:$16 sps:$4 sm:$0xff]  }
 0x21a   :  { %3529 = vmatprep.subr.bf16.mxu0 %v5634_v23  ;;  %3857 = vmatprep.subr.bf16.mxu1 %v5637_v24  ;;  %v5727_v23 = vld [vmem:[#allocation5 + $0xfec] ss:$16 sps:$4 sm:$0xff]   ;;  %v5722_v24 = vld [vmem:[#allocation5 + $0xfe0] ss:$16 sps:$4 sm:$0xff]  }
 0x21c   :  { %3521 = vmatmul.mubr.bf16.vlgmr.msra.gmra.mrb[0].mxu0 %v4283_v25  ;;  %3849 = vmatmul.mubr.bf16.vlgmr.msra.gmra.mrb[0].mxu1 %v4283_v25  ;;  %v5725_v25 = vld [vmem:[#allocation5 + $0xfe8] ss:$16 sps:$4 sm:$0xff]  }
 0x21d   :  { %3530 = vmatpush1.bf16.msra.mxu0 %v5632_v26  ;;  %3858 = vmatpush1.bf16.msra.mxu1 %v5635_v27  ;;  %v5730_v26 = vld [vmem:[#allocation8 + $0x40] sm:$0xff]  }
 0x21e   :  { %3531 = vmatprep.subr.bf16.mxu0 %v5640_v28  ;;  %3859 = vmatprep.subr.bf16.mxu1 %v5643_v19  ;;  %v5731_v27 = vld [vmem:[#allocation8 + $0xc0] sm:$0xff]   ;;  %v4285_v28 = vcombine.low %v6038_v17, %v6038_v17  ;;  %v5740_v17 = vld [vmem:[#allocation8 + $0x10] sm:$0xff]  }
 0x21f   :  { %3561 = vmatprep.mubr.bf16.mxu0 %v4286_v29  ;;  %3889 = vmatprep.mubr.bf16.mxu1 %v4286_v29  ;;  %v5732_v19 = vld [vmem:[#allocation8] sm:$0xff]  }
 0x220   :  { %v5733_v29 = vld [vmem:[#allocation8 + $0x80] sm:$0xff]  }
 0x221   :  { %3532 = vmatpush1.bf16.msra.mxu0 %v5638_v30  ;;  %3860 = vmatpush1.bf16.msra.mxu1 %v5641_v31  ;;  %v5734_v30 = vld [vmem:[#allocation8 + $0x48] sm:$0xff]  }
 0x222   :  { %3533 = vmatprep.subr.bf16.mxu0 %v5646_v14  ;;  %3861 = vmatprep.subr.bf16.mxu1 %v5649_v32  ;;  %v5735_v31 = vld [vmem:[#allocation8 + $0xc8] sm:$0xff]  }
 0x223   :  { %v5736_v14 = vld [vmem:[#allocation8 + $0x8] sm:$0xff]  }
 0x224   :  { %v5737_v32 = vld [vmem:[#allocation8 + $0x88] sm:$0xff]  }
 0x225   :  { %3534 = vmatpush1.bf16.msra.mxu0 %v5644_v33  ;;  %3862 = vmatpush1.bf16.msra.mxu1 %v5647_v34  ;;  %v5738_v33 = vld [vmem:[#allocation8 + $0x50] sm:$0xff]  }
 0x226   :  { %3535 = vmatprep.subr.bf16.mxu0 %v5652_v35  ;;  %3863 = vmatprep.subr.bf16.mxu1 %v5655_v36  ;;  %v5739_v34 = vld [vmem:[#allocation8 + $0xd0] sm:$0xff]   ;;  %v5742_v36 = vld [vmem:[#allocation8 + $0x58] sm:$0xff]  }
 0x227   :  { %v5741_v35 = vld [vmem:[#allocation8 + $0x90] sm:$0xff]  }
 0x229   :  { %3536 = vmatpush1.bf16.msra.mxu0 %v5650_v37  ;;  %3864 = vmatpush1.bf16.msra.mxu1 %v5653_v38  ;;  %v5743_v37 = vld [vmem:[#allocation8 + $0xd8] sm:$0xff]  }
 0x22a   :  { %3537 = vmatprep.subr.bf16.mxu0 %v5658_v39  ;;  %3865 = vmatprep.subr.bf16.mxu1 %v5661_v40  ;;  %v5744_v38 = vld [vmem:[#allocation8 + $0x18] sm:$0xff]   ;;  %v5746_v40 = vld [vmem:[#allocation8 + $0x60] sm:$0xff]  }
 0x22b   :  { %v5745_v39 = vld [vmem:[#allocation8 + $0x98] sm:$0xff]  }
 0x22d   :  { %3538 = vmatpush1.bf16.msra.mxu0 %v5656_v41  ;;  %3866 = vmatpush1.bf16.msra.mxu1 %v5659_v42  ;;  %v5747_v41 = vld [vmem:[#allocation8 + $0xe0] sm:$0xff]  }
 0x22e   :  { %3539 = vmatprep.subr.bf16.mxu0 %v5664_v43  ;;  %3867 = vmatprep.subr.bf16.mxu1 %v5667_v44  ;;  %v5748_v42 = vld [vmem:[#allocation8 + $0x20] sm:$0xff]   ;;  %v5750_v44 = vld [vmem:[#allocation8 + $0x68] sm:$0xff]  }
 0x22f   :  { %v5749_v43 = vld [vmem:[#allocation8 + $0xa0] sm:$0xff]  }
 0x231   :  { %3540 = vmatpush1.bf16.msra.mxu0 %v5662_v45  ;;  %3868 = vmatpush1.bf16.msra.mxu1 %v5665_v46  ;;  %v5751_v45 = vld [vmem:[#allocation8 + $0xe8] sm:$0xff]  }
 0x232   :  { %3541 = vmatprep.subr.bf16.mxu0 %v5670_v47  ;;  %3869 = vmatprep.subr.bf16.mxu1 %v5673_v48  ;;  %v5752_v46 = vld [vmem:[#allocation8 + $0x28] sm:$0xff]   ;;  %v5754_v48 = vld [vmem:[#allocation8 + $0x70] sm:$0xff]  }
 0x233   :  { %v5753_v47 = vld [vmem:[#allocation8 + $0xa8] sm:$0xff]  }
 0x235   :  { %3542 = vmatpush1.bf16.msra.mxu0 %v5668_v49  ;;  %3870 = vmatpush1.bf16.msra.mxu1 %v5671_v50  ;;  %v5755_v49 = vld [vmem:[#allocation8 + $0xf0] sm:$0xff]  }
 0x236   :  { %3543 = vmatprep.subr.bf16.mxu0 %v5676_v51  ;;  %3871 = vmatprep.subr.bf16.mxu1 %v5679_v52  ;;  %v5756_v50 = vld [vmem:[#allocation8 + $0x30] sm:$0xff]   ;;  %v5758_v52 = vld [vmem:[#allocation8 + $0x78] sm:$0xff]  }
 0x237   :  { %v5757_v51 = vld [vmem:[#allocation8 + $0xb0] sm:$0xff]  }
 0x239   :  { %3544 = vmatpush1.bf16.msra.mxu0 %v5674_v53  ;;  %3872 = vmatpush1.bf16.msra.mxu1 %v5677_v54  ;;  %v5759_v53 = vld [vmem:[#allocation8 + $0xf8] sm:$0xff]  }
 0x23a   :  { %3545 = vmatprep.subr.bf16.mxu0 %v5682_v55  ;;  %3873 = vmatprep.subr.bf16.mxu1 %v5685_v56  ;;  %v5760_v54 = vld [vmem:[#allocation8 + $0x38] sm:$0xff]   ;;  %v606_v56 = vlaneseq }
 0x23b   :  { %v5761_v55 = vld [vmem:[#allocation8 + $0xb8] sm:$0xff]  }
 0x23d   :  { %3546 = vmatpush1.bf16.msra.mxu0 %v5680_v57  ;;  %3874 = vmatpush1.bf16.msra.mxu1 %v5683_v58  ;;  %v607_v57 = vshrl.u32 %v606_v56, 7 }
 0x23e   :  { %3547 = vmatprep.subr.bf16.mxu0 %v5688_v59  ;;  %3875 = vmatprep.subr.bf16.mxu1 %v5691_v60  ;;  %v604_v60 = vld [vmem:[#allocation7] sm:$0xf] }
 0x23f   :  { %v608_v58 = vsub.s32 0, %v607_v57  ;;  %v616_v59 = vsub.s32 2, %v607_v57 }
 0x241   :  { %3548 = vmatpush1.bf16.msra.mxu0 %v5686_v61  ;;  %3876 = vmatpush1.bf16.msra.mxu1 %v5689_v62  ;;  %v612_v61 = vsub.s32 1, %v607_v57  ;;  %v620_v62 = vsub.s32 3, %v607_v57 }
 0x242   :  { %3549 = vmatprep.subr.bf16.mxu0 %v5694_v63  ;;  %3877 = vmatprep.subr.bf16.mxu1 %v5697_v0  ;;  %v609_v63 = vrot.slane %v604_v60, %v608_v58  ;;  %v617_v0 = vrot.slane %v604_v60, %v616_v59 }
 0x245   :  { %3550 = vmatpush1.bf16.msra.mxu0 %v5692_v1  ;;  %3878 = vmatpush1.bf16.msra.mxu1 %v5695_v2  ;;  %v613_v1 = vrot.slane %v604_v60, %v612_v61  ;;  %v621_v2 = vrot.slane %v604_v60, %v620_v62 }
 0x246   :  { %3551 = vmatprep.subr.bf16.mxu0 %v5700_v3  ;;  %3879 = vmatprep.subr.bf16.mxu1 %v5703_v4 }
 0x249   :  { %3552 = vmatpush1.bf16.msra.mxu0 %v5698_v5  ;;  %3880 = vmatpush1.bf16.msra.mxu1 %v5701_v6 }
 0x24a   :  { %3553 = vmatprep.subr.bf16.mxu0 %v5706_v7  ;;  %3881 = vmatprep.subr.bf16.mxu1 %v5709_v8 }
 0x24d   :  { %3554 = vmatpush1.bf16.msra.mxu0 %v5704_v9  ;;  %3882 = vmatpush1.bf16.msra.mxu1 %v5707_v10 }
 0x24e   :  { %3555 = vmatprep.subr.bf16.mxu0 %v5712_v12  ;;  %3883 = vmatprep.subr.bf16.mxu1 %v5715_v13 }
 0x251   :  { %3556 = vmatpush1.bf16.msra.mxu0 %v5710_v15  ;;  %3884 = vmatpush1.bf16.msra.mxu1 %v5713_v16 }
 0x252   :  { %3557 = vmatprep.subr.bf16.mxu0 %v5718_v18  ;;  %3885 = vmatprep.subr.bf16.mxu1 %v5721_v20 }
 0x255   :  { %3558 = vmatpush1.bf16.msra.mxu0 %v5716_v11  ;;  %3886 = vmatpush1.bf16.msra.mxu1 %v5719_v21 }
 0x256   :  { %3559 = vmatprep.subr.bf16.mxu0 %v5724_v22  ;;  %3887 = vmatprep.subr.bf16.mxu1 %v5727_v23 }
 0x259   :  { %3560 = vmatpush1.bf16.msra.mxu0 %v5722_v24  ;;  %3888 = vmatpush1.bf16.msra.mxu1 %v5725_v25 }
 0x25a   :  { %4832 = vmatprep.subr.bf16.mxu0 %v5730_v26  ;;  %4854 = vmatprep.subr.bf16.mxu1 %v5731_v27 }
 0x25c   :  { %3562 = vmatmul.mubr.bf16.vlgmr.msra.gmra.mrb[0].mxu0 %v4285_v28  ;;  %3890 = vmatmul.mubr.bf16.vlgmr.msra.gmra.mrb[0].mxu1 %v4285_v28 }
 0x25d   :  { %4833 = vmatpush3.bf16.msra.mxu0 %v5732_v19  ;;  %4855 = vmatpush3.bf16.msra.mxu1 %v5733_v29 }
 0x25e   :  { %4834 = vmatprep.subr.bf16.mxu0 %v5734_v30  ;;  %4856 = vmatprep.subr.bf16.mxu1 %v5735_v31  ;;  %v4799_v31 = vld [vmem:[#allocation10] ss:$0 sm:$0xff] }
 0x261   :  { %4835 = vmatpush3.bf16.msra.mxu0 %v5736_v14  ;;  %4857 = vmatpush3.bf16.msra.mxu1 %v5737_v32 }
 0x262   :  { %4836 = vmatprep.subr.bf16.mxu0 %v5738_v33  ;;  %4858 = vmatprep.subr.bf16.mxu1 %v5739_v34 }
 0x265   :  { %4837 = vmatpush3.bf16.msra.mxu0 %v5740_v17  ;;  %4859 = vmatpush3.bf16.msra.mxu1 %v5741_v35 }
 0x266   :  { %4838 = vmatprep.subr.bf16.mxu0 %v5742_v36  ;;  %4860 = vmatprep.subr.bf16.mxu1 %v5743_v37 }
 0x269   :  { %4839 = vmatpush3.bf16.msra.mxu0 %v5744_v38  ;;  %4861 = vmatpush3.bf16.msra.mxu1 %v5745_v39 }
 0x26a   :  { %4840 = vmatprep.subr.bf16.mxu0 %v5746_v40  ;;  %4862 = vmatprep.subr.bf16.mxu1 %v5747_v41 }
 0x26d   :  { %4841 = vmatpush3.bf16.msra.mxu0 %v5748_v42  ;;  %4863 = vmatpush3.bf16.msra.mxu1 %v5749_v43 }
 0x26e   :  { %4842 = vmatprep.subr.bf16.mxu0 %v5750_v44  ;;  %4864 = vmatprep.subr.bf16.mxu1 %v5751_v45 }
 0x271   :  { %4843 = vmatpush3.bf16.msra.mxu0 %v5752_v46  ;;  %4865 = vmatpush3.bf16.msra.mxu1 %v5753_v47 }
 0x272   :  { %4844 = vmatprep.subr.bf16.mxu0 %v5754_v48  ;;  %4866 = vmatprep.subr.bf16.mxu1 %v5755_v49 }
 0x275   :  { %4845 = vmatpush3.bf16.msra.mxu0 %v5756_v50  ;;  %4867 = vmatpush3.bf16.msra.mxu1 %v5757_v51 }
 0x276   :  { %4846 = vmatprep.subr.bf16.mxu0 %v5758_v52  ;;  %4868 = vmatprep.subr.bf16.mxu1 %v5759_v53 }
 0x279   :  { %4847 = vmatpush3.bf16.msra.mxu0 %v5760_v54  ;;  %4869 = vmatpush3.bf16.msra.mxu1 %v5761_v55 }
 0x32f   :  { %v3563_v3 = vpop.f32.mrb[0].mxu0  ;;  %v3891_v4 = vpop.f32.mrb[0].mxu1 }
 0x330   :  { %v4876_v5 = vadd.f32 %v3563_v3, %v609_v63  ;;  %v4878_v6 = vadd.f32 %v3891_v4, %v617_v0  ;;  %v3565_v7 = vpop.f32.mrb[1].mxu0  ;;  %v3893_v8 = vpop.f32.mrb[1].mxu1 }
 0x331   :  { %v4877_v9 = vadd.f32 %v3565_v7, %v613_v1  ;;  %v4879_v10 = vadd.f32 %v3893_v8, %v621_v2  ;;  %v3567_v12 = vpop.f32.mrb[2].mxu0  ;;  %v3895_v13 = vpop.f32.mrb[2].mxu1 }
 0x332   :  { %v3898_v15 = vmul.f32 0.01, %v4876_v5  ;;  %v3900_v16 = vmul.f32 0.01, %v4878_v6  ;;  %v3568_v18 = vpop.f32.mrb[3].mxu0  ;;  %v3896_v20 = vpop.f32.mrb[3].mxu1 }
 0x333   :  { %v3899_v11 = vmul.f32 0.01, %v4877_v9  ;;  %v3901_v21 = vmul.f32 0.01, %v4879_v10 }
 0x334   :  { %v3902_v22 = vmax.f32 %v4876_v5, %v3898_v15  ;;  %v3904_v23 = vmax.f32 %v4878_v6, %v3900_v16 }
 0x335   :  { %v3903_v24 = vmax.f32 %v4877_v9, %v3899_v11  ;;  %v3905_v25 = vmax.f32 %v4879_v10, %v3901_v21 }
 0x336   :  { %v3906_v28 = vpack.c.bf16 %v3902_v22, %v3902_v22  ;;  %v3908_v19 = vpack.c.bf16 %v3904_v23, %v3904_v23 }
 0x337   :  { %v3907_v26 = vpack.c.bf16 %v3903_v24, %v3903_v24  ;;  %v3909_v27 = vpack.c.bf16 %v3905_v25, %v3905_v25 }
 0x339   :  { %4205 = vmatprep.mubr.bf16.mxu0 %v3907_v26  ;;  %4245 = vmatprep.mubr.bf16.mxu1 %v3909_v27 }
 0x33a   :  { %4206 = vmatmul.mubr.bf16.vlgmr.msra.gmra.mrb[4].mxu0 %v3906_v28  ;;  %4246 = vmatmul.mubr.bf16.vlgmr.msra.gmra.mrb[4].mxu1 %v3908_v19 }
 0x40d   :  { %v4848_v29 = vpop.f32.mrb[4].mxu0  ;;  %v4870_v30 = vpop.f32.mrb[4].mxu1 }
 0x40e   :  { %v4849_v14 = vpop.f32.mrb[5].mxu0  ;;  %v4871_v32 = vpop.f32.mrb[5].mxu1 }
 0x40f   :  { %v4850_v33 = vadd.f32 %v4849_v14, %v4848_v29  ;;  %v4872_v34 = vadd.f32 %v4871_v32, %v4870_v30  ;;  %v4851_v17 = vpop.f32.mrb[6].mxu0  ;;  %v4873_v35 = vpop.f32.mrb[6].mxu1 }
 0x410   :  { %v4852_v36 = vpop.f32.mrb[7].mxu0  ;;  %v4874_v37 = vpop.f32.mrb[7].mxu1 }
 0x411   :  { %v4208_v38 = vadd.f32 %v4850_v33, %v4799_v31 }
 0x413   :  { %v4248_v39 = vadd.f32 %v4872_v34, %v4208_v38 }
 0x415   :  { %4253 = vst [vmem:[#allocation11] sm:$0xff] %v4248_v39 }
 0x416   :  { %5883 = shalt.err (!%p5880_p2)
}
 0x417   :  { %s5884_s6 = scalar_lea.hbm %s6061_s5, 128 }
 0x418   :  { %p5885_p3 = scmp.ne.s32.totalorder %s6061_s5, %s5884_s6  ;;  %p5888_p4 = scmp.lt.u32.totalorder %s5884_s6, %s6061_s5 }
 0x41a   :  { %p5890_p5 = pnand %p5888_p4, %p5885_p3 }
 0x41c   :  { %5893 = shalt.err (!%p5890_p5)
}
 0x41d   :  { %4263 = dma.vmem_to_hbm [thread:$0]  %s4261_s28, 128, %s6061_s5, [#allocation4]  }
 0x41e   :  { %5900 = dma.done.wait [#allocation4], 128  }
 0x41f   :  { %5901 = vsyncadd [#allocation4], 4294967168 }
 0x420   :  { %4267 = vsyncpa [#allocation3], 1 }
 0x421   :  { %4268 = vsyncpa [#allocation6], 1 }
 0x422   :  { %4269 = vsyncpa [#allocation9], 1 }
 0x423   :  { %4270 = vsyncpa [#allocation4], 1 }

</bundles_post_ra>
